<compile_context>
chip_gen: v7x
topology: tpu7x:2x2x1
jax: 0.10.0
libtpu: 0.0.40
codegen_flags: <defaults>
</compile_context>

<pallas_src>
import functools

import jax
import jax.numpy as jnp
from jax import lax
from jax.experimental import pallas as pl
from jax.experimental.pallas import tpu as pltpu

BN_EPS = 1e-5  # PyTorch BatchNorm2d default


# ----------------------------------------------------------------------------------
# Pass 1: conv2d as a single im2col bf16 matmul per image + per-channel sum / sumsq
# accumulated across the batch ("arbitrary" grid axis, resident stats output block).
# ----------------------------------------------------------------------------------
def _conv_stats_kernel(x_ref, w_ref, b_ref, y_ref, stats_ref, xp_ref, *,
                       H, W, KH, KW, PH, PW, H_out, W_out, Cin, Cp):
    f32 = jnp.float32
    HW = H_out * W_out
    i = pl.program_id(0)

    @pl.when(i == 0)
    def _init():
        stats_ref[...] = jnp.zeros_like(stats_ref)
        # Zero the padded-input scratch once; only the zero border is reused across steps
        # (the interior is fully overwritten every step below).
        xp_ref[...] = jnp.zeros_like(xp_ref)

    # Write the current image into the interior of the zero-padded scratch (write-once pad,
    # no concat copies).  x arrives as bf16 (halved HBM DMA); scratch is f32.
    xp_ref[PH:PH + H, PW:PW + W, :] = x_ref[0].astype(f32)

    # im2col: KH*KW shifted views concatenated along the channel (lane) axis.
    cols = []
    for kh in range(KH):
        for kw in range(KW):
            cols.append(xp_ref[kh:kh + H_out, kw:kw + W_out, :])   # (H_out, W_out, Cin)
    lhs = jnp.concatenate(cols, axis=-1).reshape(HW, KH * KW * Cin)

    # One MXU matmul (bf16 operands, f32 accumulation) instead of KH*KW tap matmuls.
    acc = jnp.dot(lhs.astype(jnp.bfloat16), w_ref[...],
                  preferred_element_type=f32)                      # (HW, Cp)
    acc = acc + b_ref[...]                                         # conv bias

    y_ref[...] = acc.reshape(1, H_out, W_out, Cp).astype(y_ref.dtype)

    # Per-channel sum and sum-of-squares in one MXU push: ones(1, HW) @ [acc | acc*acc].
    moments = jnp.dot(jnp.ones((1, HW), f32),
                      jnp.concatenate([acc, acc * acc], axis=-1),
                      preferred_element_type=f32)                  # (1, 2*Cp)
    stats_ref[...] += moments
    # TODO(synk): BatchNorm running_mean/running_var buffer updates are training-state side
    # effects, not part of the forward output, so they are not materialized here.


# ----------------------------------------------------------------------------------
# Pass 2: BN affine (precomputed per-channel scale/shift) + ReLU + MaxPool2d(3,2,1),
# per image ("parallel" grid axis).  Pool is separable and evaluated only at the even
# output positions (zero padding is exact because post-ReLU activations are >= 0).
# ----------------------------------------------------------------------------------
def _bn_relu_pool_kernel(y_ref, scale_ref, shift_ref, o_ref, *,
                         H_out, W_out, Ho, Wo, Cp, Cout):
    f32 = jnp.float32
    y = y_ref[0].astype(f32)                                       # (H_out, W_out, Cp)
    scale = scale_ref[...].reshape(1, 1, Cp)
    shift = shift_ref[...].reshape(1, 1, Cp)
    z = jnp.maximum(y * scale + shift, 0.0)                        # BN affine + ReLU
    # TODO(synk): on v6e/v7x the temporaries below could be bf16; kept f32 so the same
    # kernel is optimal on v5e (no bf16 VPU).

    # -- W axis: pooled_w[j] = max(z[2j-1], z[2j], z[2j+1]), z[-1] := 0 --
    zw = z.reshape(H_out, Wo, 2, Cp)
    ev = zw[:, :, 0, :]                                            # z[2j]
    od = zw[:, :, 1, :]                                            # z[2j+1]
    odm = jnp.concatenate([jnp.zeros((H_out, 1, Cp), f32), od[:, :Wo - 1, :]],
                          axis=1)                                  # z[2j-1]
    pw = jnp.maximum(jnp.maximum(ev, od), odm)                     # (H_out, Wo, Cp)

    # -- H axis: pooled[i] = max(pw[2i-1], pw[2i], pw[2i+1]), pw[-1] := 0 --
    ph = pw.reshape(Ho, 2, Wo, Cp)
    evh = ph[:, 0, :, :]
    odh = ph[:, 1, :, :]
    odhm = jnp.concatenate([jnp.zeros((1, Wo, Cp), f32), odh[:Ho - 1, :, :]],
                           axis=0)
    pooled = jnp.maximum(jnp.maximum(evh, odh), odhm)              # (Ho, Wo, Cp)

    # Write only the real Cout channels (no 16x lane-padded HBM writeback).
    o_ref[...] = pooled[:, :, :Cout].reshape(1, Ho, Wo, Cout).astype(o_ref.dtype)


# ----------------------------------------------------------------------------------
# Wrapper (glue: layout transposes, lane padding of channel params, BN scale/shift math)
# ----------------------------------------------------------------------------------
def prep_block_forward(x_nchw, params, *, stride=1, padding=1):
    w_oihw, b = params["w"], params["b"]
    gamma, beta = params["gamma"], params["beta"]
    Cout, Cin, KH, KW = w_oihw.shape
    N, _, H, W = x_nchw.shape

    if stride != 1:
        # TODO(synk): strided conv path not implemented; PrepBlock is used with stride=1.
        raise NotImplementedError("prep_block_forward currently supports stride=1 only")

    Hp, Wp = H + 2 * padding, W + 2 * padding
    H_out, W_out = Hp - KH + 1, Wp - KW + 1
    # TODO(synk): odd conv-output sizes (PyTorch floor-mode pool) not supported by the
    # even-position subsampling path.
    assert H_out % 2 == 0 and W_out % 2 == 0, "pool subsampling expects even conv output"
    Ho, Wo = H_out // 2, W_out // 2
    HW = H_out * W_out

    LANES = 128
    Cp = ((Cout + LANES - 1) // LANES) * LANES                     # lane-dense channel count
    K = KH * KW * Cin

    # NCHW -> NHWC, bf16 (halves input DMA; accumulation is f32 on the MXU).
    x = jnp.transpose(x_nchw, (0, 2, 3, 1)).astype(jnp.bfloat16)

    # (Cout, Cin, KH, KW) -> im2col weight (KH*KW*Cin, Cp), zero-padded output lanes, bf16.
    w = jnp.transpose(w_oihw, (2, 3, 1, 0)).reshape(K, Cout).astype(jnp.float32)
    w = jnp.pad(w, ((0, 0), (0, Cp - Cout))).astype(jnp.bfloat16)
    b2 = jnp.pad(b.astype(jnp.float32), (0, Cp - Cout)).reshape(1, Cp)

    f32b, bf16b = 4, 2

    # ---------------- pass 1: conv + BN moments ----------------
    kern1 = functools.partial(_conv_stats_kernel, H=H, W=W, KH=KH, KW=KW,
                              PH=padding, PW=padding, H_out=H_out, W_out=W_out,
                              Cin=Cin, Cp=Cp)
    p1_block = (H * W * Cin * bf16b + K * Cp * bf16b + Cp * f32b
                + HW * Cp * bf16b + 2 * Cp * f32b)
    p1_live = Hp * Wp * Cin * f32b + HW * K * (f32b + bf16b) + 4 * HW * Cp * f32b
    p1_vmem = int(min(max(2 * p1_block + p1_live + (4 << 20), 8 << 20), 48 << 20))

    y, stats = pl.pallas_call(
        kern1,
        out_shape=(jax.ShapeDtypeStruct((N, H_out, W_out, Cp), jnp.bfloat16),
                   jax.ShapeDtypeStruct((1, 2 * Cp), jnp.float32)),
        grid_spec=pltpu.PrefetchScalarGridSpec(
            num_scalar_prefetch=0,
            grid=(N,),
            in_specs=[
                pl.BlockSpec((1, H, W, Cin), lambda i: (i, 0, 0, 0)),
                pl.BlockSpec((K, Cp), lambda i: (0, 0)),
                pl.BlockSpec((1, Cp), lambda i: (0, 0)),
            ],
            out_specs=[
                pl.BlockSpec((1, H_out, W_out, Cp), lambda i: (i, 0, 0, 0)),
                pl.BlockSpec((1, 2 * Cp), lambda i: (0, 0)),      # resident accumulator
            ],
            scratch_shapes=[pltpu.VMEM((Hp, Wp, Cin), jnp.float32)],
        ),
        compiler_params=pltpu.CompilerParams(
            dimension_semantics=("arbitrary",),                    # stats reduction axis
            vmem_limit_bytes=p1_vmem),
        cost_estimate=pl.CostEstimate(
            flops=2 * N * HW * K * Cp + 4 * N * HW * Cp,
            transcendentals=0,
            bytes_accessed=(N * H * W * Cin * bf16b + K * Cp * bf16b + Cp * f32b
                            + N * HW * Cp * bf16b + 2 * Cp * f32b)),
    )(x, w, b2)

    # ---------------- per-channel BN scale/shift from the moments (tiny glue math) -------
    cnt = float(N * HW)
    s, ss = stats[0, :Cp], stats[0, Cp:]
    mean = s / cnt
    var = jnp.maximum(ss / cnt - mean * mean, 0.0)                 # biased var (train forward)
    inv_std = lax.rsqrt(var + BN_EPS)
    g2 = jnp.pad(gamma.astype(jnp.float32), (0, Cp - Cout))        # padded channels -> scale 0
    beta2 = jnp.pad(beta.astype(jnp.float32), (0, Cp - Cout))
    scale = (g2 * inv_std).reshape(1, Cp)
    shift = (beta2 - mean * g2 * inv_std).reshape(1, Cp)

    # ---------------- pass 2: normalize + ReLU + MaxPool ----------------
    kern2 = functools.partial(_bn_relu_pool_kernel, H_out=H_out, W_out=W_out,
                              Ho=Ho, Wo=Wo, Cp=Cp, Cout=Cout)
    p2_block = HW * Cp * bf16b + 2 * Cp * f32b + Ho * Wo * Cout * f32b
    p2_live = 2 * HW * Cp * f32b + 4 * H_out * Wo * Cp * f32b + 4 * Ho * Wo * Cp * f32b
    p2_vmem = int(min(max(2 * p2_block + p2_live + (4 << 20), 8 << 20), 48 << 20))

    out_nhwc = pl.pallas_call(
        kern2,
        out_shape=jax.ShapeDtypeStruct((N, Ho, Wo, Cout), jnp.float32),
        grid_spec=pltpu.PrefetchScalarGridSpec(
            num_scalar_prefetch=0,
            grid=(N,),
            in_specs=[
                pl.BlockSpec((1, H_out, W_out, Cp), lambda i: (i, 0, 0, 0)),
                pl.BlockSpec((1, Cp), lambda i: (0, 0)),
                pl.BlockSpec((1, Cp), lambda i: (0, 0)),
            ],
            out_specs=pl.BlockSpec((1, Ho, Wo, Cout), lambda i: (i, 0, 0, 0)),
        ),
        compiler_params=pltpu.CompilerParams(
            dimension_semantics=("parallel",),                     # independent per image
            vmem_limit_bytes=p2_vmem),
        cost_estimate=pl.CostEstimate(
            flops=2 * N * HW * Cp + 4 * N * HW * Cp,
            transcendentals=0,
            bytes_accessed=(N * HW * Cp * bf16b + 2 * Cp * f32b
                            + N * Ho * Wo * Cout * f32b)),
    )(y, scale, shift)

    # NHWC -> NCHW to match the PyTorch module output (glue).
    return jnp.transpose(out_nhwc, (0, 3, 1, 2))


# ----------------------------------------------------------------------------------
# Pure-JAX reference (correctness check).  Inputs are rounded through bf16 so the
# comparison isolates kernel semantics from the (intentional) bf16 MXU-operand cast;
# remaining differences are the bf16 conv-activation intermediate and accumulation
# order, covered by the rtol/atol below.
# ----------------------------------------------------------------------------------
def prep_block_ref(x_nchw, params, *, stride=1, padding=1):
    w, b = params["w"], params["b"]
    gamma, beta = params["gamma"], params["beta"]
    xq = x_nchw.astype(jnp.bfloat16).astype(jnp.float32)
    wq = w.astype(jnp.bfloat16).astype(jnp.float32)
    y = lax.conv_general_dilated(
        xq, wq, (stride, stride), [(padding, padding), (padding, padding)],
        dimension_numbers=("NCHW", "OIHW", "NCHW"))
    y = y + b.astype(jnp.float32).reshape(1, -1, 1, 1)
    mean = jnp.mean(y, axis=(0, 2, 3), keepdims=True)
    var = jnp.mean((y - mean) ** 2, axis=(0, 2, 3), keepdims=True)
    y = (y - mean) * lax.rsqrt(var + BN_EPS) * gamma.reshape(1, -1, 1, 1) + beta.reshape(1, -1, 1, 1)
    y = jnp.maximum(y, 0.0)
    z = lax.reduce_window(y, -jnp.inf, lax.max,
                          (1, 1, 3, 3), (1, 1, 2, 2),
                          [(0, 0), (0, 0), (1, 1), (1, 1)])
    return z


if __name__ == "__main__":
    key = jax.random.PRNGKey(0)
    k_x, k_w, k_b, k_g, k_be = jax.random.split(key, 5)

    # Small shapes consistent with PrepBlock(in_channels=4, out_channels=8, 3, 1, 1)
    N, Cin, H, W = 2, 4, 16, 16
    Cout, Ksz, stride, padding = 8, 3, 1, 1

    x = jax.random.normal(k_x, (N, Cin, H, W), jnp.float32)
    params = {
        "w": 0.1 * jax.random.normal(k_w, (Cout, Cin, Ksz, Ksz), jnp.float32),
        "b": 0.1 * jax.random.normal(k_b, (Cout,), jnp.float32),
        "gamma": 1.0 + 0.1 * jax.random.normal(k_g, (Cout,), jnp.float32),
        "beta": 0.1 * jax.random.normal(k_be, (Cout,), jnp.float32),
    }

    out = prep_block_forward(x, params, stride=stride, padding=padding)
    out = jax.block_until_ready(out)

    ref = prep_block_ref(x, params, stride=stride, padding=padding)
    assert out.shape == (N, Cout, 8, 8), out.shape
    assert jnp.allclose(out, ref, atol=5e-3, rtol=5e-3), float(jnp.max(jnp.abs(out - ref)))

    print("KERNEL_OK")
</pallas_src>

<mosaic_0001>
module attributes {stable_mosaic.version = 11 : i64} {
  func.func @_conv_stats_kernel(%arg0: i32, %arg1: memref<1x16x16x4xbf16, #tpu.memory_space<vmem>>, %arg2: memref<36x128xbf16, #tpu.memory_space<vmem>>, %arg3: memref<1x128xf32, #tpu.memory_space<vmem>>, %arg4: memref<1x16x16x128xbf16, #tpu.memory_space<vmem>>, %arg5: memref<1x256xf32, #tpu.memory_space<vmem>>, %arg6: memref<18x18x4xf32, #tpu.memory_space<vmem>>) attributes {dimension_semantics = [#tpu.dimension_semantics<arbitrary>], iteration_bounds = array<i64: 2>, scalar_prefetch = 0 : i64, scratch_operands = 1 : i64, tpu.core_type = #tpu.core_type<tc>, window_params = [{transform_indices = @transform_0, window_bounds = array<i64: 1, 16, 16, 4>}, {pipeline_mode = #tpu.pipeline_mode<synchronous>, transform_indices = @transform_1, window_bounds = array<i64: 36, 128>}, {pipeline_mode = #tpu.pipeline_mode<synchronous>, transform_indices = @transform_2, window_bounds = array<i64: 1, 128>}, {transform_indices = @transform_3, window_bounds = array<i64: 1, 16, 16, 128>}, {pipeline_mode = #tpu.pipeline_mode<synchronous>, transform_indices = @transform_4, window_bounds = array<i64: 1, 256>}]} {
    %c0_i32 = arith.constant 0 : i32
    %0 = arith.cmpi eq, %arg0, %c0_i32 : i32
    %1 = arith.extui %0 : i1 to i32
    %c0_i32_0 = arith.constant 0 : i32
    %2 = arith.cmpi ne, %1, %c0_i32_0 : i32
    scf.if %2 {
      %cst_46 = arith.constant 0.000000e+00 : f32
      %34 = vector.broadcast %cst_46 : f32 to vector<1x256xf32>
      %c0_47 = arith.constant 0 : index
      %c0_48 = arith.constant 0 : index
      %35 = vector.load %arg5[%c0_47, %c0_48] : memref<1x256xf32, #tpu.memory_space<vmem>>, vector<1x256xf32>
      tpu.vector_store %arg5[%c0_47, %c0_48], %34 {strides = array<i32>} : memref<1x256xf32, #tpu.memory_space<vmem>>, vector<1x256xf32>,
      %cst_49 = arith.constant 0.000000e+00 : f32
      %36 = vector.broadcast %cst_49 : f32 to vector<18x18x4xf32>
      %c0_50 = arith.constant 0 : index
      %c0_51 = arith.constant 0 : index
      %c0_52 = arith.constant 0 : index
      %37 = vector.load %arg6[%c0_50, %c0_51, %c0_52] : memref<18x18x4xf32, #tpu.memory_space<vmem>>, vector<18x18x4xf32>
      tpu.vector_store %arg6[%c0_50, %c0_51, %c0_52], %36 {strides = array<i32>} : memref<18x18x4xf32, #tpu.memory_space<vmem>>, vector<18x18x4xf32>,
    } else {
    }
    %c0 = arith.constant 0 : index
    %c0_1 = arith.constant 0 : index
    %c0_2 = arith.constant 0 : index
    %c0_3 = arith.constant 0 : index
    %3 = vector.load %arg1[%c0, %c0_1, %c0_2, %c0_3] : memref<1x16x16x4xbf16, #tpu.memory_space<vmem>>, vector<1x16x16x4xbf16>
    %4 = vector.shape_cast %3 : vector<1x16x16x4xbf16> to vector<16x16x4xbf16>
    %5 = arith.extf %4 : vector<16x16x4xbf16> to vector<16x16x4xf32>
    %c1 = arith.constant 1 : index
    %c1_4 = arith.constant 1 : index
    %c0_5 = arith.constant 0 : index
    %6 = vector.load %arg6[%c1, %c1_4, %c0_5] : memref<18x18x4xf32, #tpu.memory_space<vmem>>, vector<16x16x4xf32>
    tpu.vector_store %arg6[%c1, %c1_4, %c0_5], %5 {strides = array<i32>} : memref<18x18x4xf32, #tpu.memory_space<vmem>>, vector<16x16x4xf32>,
    %c0_6 = arith.constant 0 : index
    %c0_7 = arith.constant 0 : index
    %c0_8 = arith.constant 0 : index
    %7 = vector.load %arg6[%c0_6, %c0_7, %c0_8] : memref<18x18x4xf32, #tpu.memory_space<vmem>>, vector<16x16x4xf32>
    %c0_9 = arith.constant 0 : index
    %c1_10 = arith.constant 1 : index
    %c0_11 = arith.constant 0 : index
    %8 = vector.load %arg6[%c0_9, %c1_10, %c0_11] : memref<18x18x4xf32, #tpu.memory_space<vmem>>, vector<16x16x4xf32>
    %c0_12 = arith.constant 0 : index
    %c2 = arith.constant 2 : index
    %c0_13 = arith.constant 0 : index
    %9 = vector.load %arg6[%c0_12, %c2, %c0_13] : memref<18x18x4xf32, #tpu.memory_space<vmem>>, vector<16x16x4xf32>
    %c1_14 = arith.constant 1 : index
    %c0_15 = arith.constant 0 : index
    %c0_16 = arith.constant 0 : index
    %10 = vector.load %arg6[%c1_14, %c0_15, %c0_16] : memref<18x18x4xf32, #tpu.memory_space<vmem>>, vector<16x16x4xf32>
    %c1_17 = arith.constant 1 : index
    %c1_18 = arith.constant 1 : index
    %c0_19 = arith.constant 0 : index
    %11 = vector.load %arg6[%c1_17, %c1_18, %c0_19] : memref<18x18x4xf32, #tpu.memory_space<vmem>>, vector<16x16x4xf32>
    %c1_20 = arith.constant 1 : index
    %c2_21 = arith.constant 2 : index
    %c0_22 = arith.constant 0 : index
    %12 = vector.load %arg6[%c1_20, %c2_21, %c0_22] : memref<18x18x4xf32, #tpu.memory_space<vmem>>, vector<16x16x4xf32>
    %c2_23 = arith.constant 2 : index
    %c0_24 = arith.constant 0 : index
    %c0_25 = arith.constant 0 : index
    %13 = vector.load %arg6[%c2_23, %c0_24, %c0_25] : memref<18x18x4xf32, #tpu.memory_space<vmem>>, vector<16x16x4xf32>
    %c2_26 = arith.constant 2 : index
    %c1_27 = arith.constant 1 : index
    %c0_28 = arith.constant 0 : index
    %14 = vector.load %arg6[%c2_26, %c1_27, %c0_28] : memref<18x18x4xf32, #tpu.memory_space<vmem>>, vector<16x16x4xf32>
    %c2_29 = arith.constant 2 : index
    %c2_30 = arith.constant 2 : index
    %c0_31 = arith.constant 0 : index
    %15 = vector.load %arg6[%c2_29, %c2_30, %c0_31] : memref<18x18x4xf32, #tpu.memory_space<vmem>>, vector<16x16x4xf32>
    %16 = tpu.concatenate %7, %8, %9, %10, %11, %12, %13, %14, %15 in 2 : vector<16x16x4xf32>, vector<16x16x4xf32>, vector<16x16x4xf32>, vector<16x16x4xf32>, vector<16x16x4xf32>, vector<16x16x4xf32>, vector<16x16x4xf32>, vector<16x16x4xf32>, vector<16x16x4xf32> -> vector<16x16x36xf32>
    %17 = vector.shape_cast %16 : vector<16x16x36xf32> to vector<256x36xf32>
    %18 = arith.truncf %17 : vector<256x36xf32> to vector<256x36xbf16>
    %c0_32 = arith.constant 0 : index
    %c0_33 = arith.constant 0 : index
    %19 = vector.load %arg2[%c0_32, %c0_33] : memref<36x128xbf16, #tpu.memory_space<vmem>>, vector<36x128xbf16>
    %cst = arith.constant dense<0.000000e+00> : vector<256x128xf32>
    %20 = tpu.matmul %18, %19, %cst {dimension_numbers = #tpu.dot_dimension_numbers<[1], [0], [0], [1], [0, 0, 1, 1], [], []>} : vector<256x36xbf16>, vector<36x128xbf16>, vector<256x128xf32> -> vector<256x128xf32>
    %c0_34 = arith.constant 0 : index
    %c0_35 = arith.constant 0 : index
    %21 = vector.load %arg3[%c0_34, %c0_35] : memref<1x128xf32, #tpu.memory_space<vmem>>, vector<1x128xf32>
    %22 = vector.broadcast %21 : vector<1x128xf32> to vector<256x128xf32>
    %23 = arith.addf %20, %22 : vector<256x128xf32>
    %24 = vector.shape_cast %23 : vector<256x128xf32> to vector<1x16x16x128xf32>
    %25 = arith.truncf %24 : vector<1x16x16x128xf32> to vector<1x16x16x128xbf16>
    %c0_36 = arith.constant 0 : index
    %c0_37 = arith.constant 0 : index
    %c0_38 = arith.constant 0 : index
    %c0_39 = arith.constant 0 : index
    %26 = vector.load %arg4[%c0_36, %c0_37, %c0_38, %c0_39] : memref<1x16x16x128xbf16, #tpu.memory_space<vmem>>, vector<1x16x16x128xbf16>
    tpu.vector_store %arg4[%c0_36, %c0_37, %c0_38, %c0_39], %25 {strides = array<i32>} : memref<1x16x16x128xbf16, #tpu.memory_space<vmem>>, vector<1x16x16x128xbf16>,
    %cst_40 = arith.constant 1.000000e+00 : f32
    %27 = vector.broadcast %cst_40 : f32 to vector<1x256xf32>
    %28 = arith.mulf %23, %23 : vector<256x128xf32>
    %29 = tpu.concatenate %23, %28 in 1 : vector<256x128xf32>, vector<256x128xf32> -> vector<256x256xf32>
    %cst_41 = arith.constant dense<0.000000e+00> : vector<1x256xf32>
    %30 = tpu.matmul %27, %29, %cst_41 {dimension_numbers = #tpu.dot_dimension_numbers<[1], [0], [0], [1], [0, 0, 1, 1], [], []>} : vector<1x256xf32>, vector<256x256xf32>, vector<1x256xf32> -> vector<1x256xf32>
    %c0_42 = arith.constant 0 : index
    %c0_43 = arith.constant 0 : index
    %31 = vector.load %arg5[%c0_42, %c0_43] : memref<1x256xf32, #tpu.memory_space<vmem>>, vector<1x256xf32>
    %32 = arith.addf %31, %30 : vector<1x256xf32>
    %c0_44 = arith.constant 0 : index
    %c0_45 = arith.constant 0 : index
    %33 = vector.load %arg5[%c0_44, %c0_45] : memref<1x256xf32, #tpu.memory_space<vmem>>, vector<1x256xf32>
    tpu.vector_store %arg5[%c0_44, %c0_45], %32 {strides = array<i32>} : memref<1x256xf32, #tpu.memory_space<vmem>>, vector<1x256xf32>,
    return
  }
  func.func @transform_0(%arg0: i32) -> (i32, i32, i32, i32) {
    %c0_i32 = arith.constant 0 : i32
    %c0_i32_0 = arith.constant 0 : i32
    %c0_i32_1 = arith.constant 0 : i32
    %c0_i32_2 = arith.constant 0 : i32
    return %arg0, %c0_i32, %c0_i32_0, %c0_i32_1 : i32, i32, i32, i32
  }
  func.func @transform_1(%arg0: i32) -> (i32, i32) {
    %c0_i32 = arith.constant 0 : i32
    %c0_i32_0 = arith.constant 0 : i32
    %c0_i32_1 = arith.constant 0 : i32
    return %c0_i32, %c0_i32_0 : i32, i32
  }
  func.func @transform_2(%arg0: i32) -> (i32, i32) {
    %c0_i32 = arith.constant 0 : i32
    %c0_i32_0 = arith.constant 0 : i32
    %c0_i32_1 = arith.constant 0 : i32
    return %c0_i32, %c0_i32_0 : i32, i32
  }
  func.func @transform_3(%arg0: i32) -> (i32, i32, i32, i32) {
    %c0_i32 = arith.constant 0 : i32
    %c0_i32_0 = arith.constant 0 : i32
    %c0_i32_1 = arith.constant 0 : i32
    %c0_i32_2 = arith.constant 0 : i32
    return %arg0, %c0_i32, %c0_i32_0, %c0_i32_1 : i32, i32, i32, i32
  }
  func.func @transform_4(%arg0: i32) -> (i32, i32) {
    %c0_i32 = arith.constant 0 : i32
    %c0_i32_0 = arith.constant 0 : i32
    %c0_i32_1 = arith.constant 0 : i32
    return %c0_i32, %c0_i32_0 : i32, i32
  }
}

</mosaic_0001>

<bundles_post_ra>
// kernel: tpu_custom_call.1
= control target key start
LH: loop header
LB: loop body
LE: loop exit
PB: predicated region body
PF: predicated region fallthrough
CT: control target
= control target key end

     0   :  { %10 = vsyncpa [#allocation4], 0  ;;  %s4850_s0 = inlined_call_operand.vmem [shape: bf16[2,16,16,4], index: 0, kind: input, shape index: {}]   ;;  %s4851_s1 = inlined_call_operand.vmem [shape: bf16[36,128], index: 1, kind: input, shape index: {}]   ;;  %s4852_s2 = inlined_call_operand.vmem [shape: f32[1,128], index: 2, kind: input, shape index: {}]   ;;  %s4853_s3 = inlined_call_operand.hbm [shape: bf16[2,16,16,128], index: 3, kind: output, shape index: {0}]   ;;  %s4854_s4 = inlined_call_operand.hbm [shape: f32[1,256], index: 4, kind: output, shape index: {1}]  }
   0x1   :  { %12 = vsyncpa [#allocation4 + $0x1], 0 }
   0x2   :  { %13 = vsyncpa [#allocation6], 0  ;;  %s3811_s15 = smov 0   ;;  %s3813_s16 = smov 0  }
   0x3   :  { %s3815_s17 = smov 0   ;;  %s3817_s18 = smov 0  }
   0x4 LB: > { %s3832_s19 = sadd.s32 4294967295, %s3770_s18   ;;  %s2578_s20 = sadd.s32 4294967294, %s3770_s18   ;;  %s3770_s18 = sphi %s3817_s18, %s4860_s18   ;;  %s3766_s17 = sphi %s3815_s17, %s4859_s17   ;;  %s3762_s16 = sphi %s3813_s16, %s4858_s16   ;;  %s3758_s15 = sphi %s3811_s15, %s4857_s15  }
   0x5   : > { %s3836_s21 = sadd.s32 1, %s3770_s18   ;;  %s94_s22 = sadd.s32 1, %s3766_s17 }
   0x6   : > { %s91_s23 = ssub.s32 %s3770_s18, %s3836_s21  ;;  %p104_p0 = scmp.ne.s32.totalorder %s3766_s17, %s3762_s16 }
   0x7   : > { %p92_p1 = scmp.eq.s32.totalorder %s91_s23, 0  ;;  %p105_p2 = scmp.eq.s32.totalorder %s3832_s19, 1 }
   0x8   : > { %p110_p3 = scmp.ne.s32.totalorder %s3762_s16, %s3758_s15  ;;  %p111_p4 = scmp.eq.s32.totalorder %s2578_s20, 1 }
   0x9   : > { %s3847_s24 = scalar_select %p92_p1, %s3766_s17, %s94_s22  }
   0xa   : > { %p3851_p5 = por %p105_p2, %p104_p0  ;;  %p3855_p6 = por %p111_p4, %p110_p3 }
   0xb   : > { %p2581_p7 = scmp.ge.s32.totalorder %s3770_s18, 1  ;;  %p164_p8 = scmp.lt.s32.totalorder %s3770_s18, 3 }
   0xd   : > { %p165_p9 = pnand %p2581_p7, %p164_p8 }
   0xe   : > { %s185_s27 = sand.u32 (!%p165_p9), 1, %s3762_s16   ;;  %p190_p10 = scmp.lt.s32.totalorder (!%p165_p9), %s3832_s19, 1 }
   0xf   : > { %168 = sbr.rel (%p165_p9) target bundleno = 901 (0x385), region = 32  ;;  %s2582_s28 = sshll.u32 (!%p165_p9), %s185_s27, 7 }
  0x10   : > { %s3871_s8 = scalar_lea.vmem (!%p165_p9), [#allocation3], %s2582_s28  ;;  %p2585_p11 = scmp.ne.s32.totalorder (!%p165_p9), %s3832_s19, 0 }
  0x16   : > { %s191_s29 = scalar_select %p190_p10, %s3832_s19, 1 }
  0x17   : > { %199 = sbr.rel (%p2585_p11) target bundleno = 52 (0x34), region = 36  ;;  %v200_v0 = vlaneseq (!%p2585_p11)  ;;  %vm205_vm0 = vcmask (!%p2585_p11), 31744   ;;  %vm208_vm1 = vcmask (!%p2585_p11), 25600   ;;  %v3772_v1 = vmov (!%p2585_p11), 0.0  }
  0x18   : > { %s2645_s30 = sshll.u32 %s191_s29, 7  ;;  %206 = vst.msk [vmem:[#allocation2] sm:$0xff] (!%p2585_p11), %vm205_vm0, %v3772_v1  ;;  %207 = vst.msk [vmem:[#allocation2 + $0x8] sm:$0xff] (!%p2585_p11), %vm205_vm0, %v3772_v1 }
  0x19   : > { %s3869_s7 = scalar_lea.vmem %s4850_s0, %s2645_s30  ;;  %210 = vst.msk [vmem:[#allocation2 + $0x18] sm:$0xff] (!%p2585_p11), %vm205_vm0, %v3772_v1  ;;  %211 = vst.msk [vmem:[#allocation2 + $0x20] sm:$0xff] (!%p2585_p11), %vm205_vm0, %v3772_v1  ;;  %vm202_vm2 = vcmp.lt.s32.totalorder (!%p2585_p11), %v200_v0, 256 }
  0x1a   : > { %213 = vst.msk [vmem:[#allocation2 + $0x30] sm:$0xff] (!%p2585_p11), %vm205_vm0, %v3772_v1  ;;  %214 = vst.msk [vmem:[#allocation2 + $0x38] sm:$0xff] (!%p2585_p11), %vm205_vm0, %v3772_v1 }
  0x1b   : > { %216 = vst.msk [vmem:[#allocation2 + $0x48] sm:$0xff] (!%p2585_p11), %vm205_vm0, %v3772_v1  ;;  %217 = vst.msk [vmem:[#allocation2 + $0x50] sm:$0xff] (!%p2585_p11), %vm205_vm0, %v3772_v1 }
  0x1c   : > { %219 = vst.msk [vmem:[#allocation2 + $0x60] sm:$0xff] (!%p2585_p11), %vm205_vm0, %v3772_v1  ;;  %220 = vst.msk [vmem:[#allocation2 + $0x68] sm:$0xff] (!%p2585_p11), %vm205_vm0, %v3772_v1 }
  0x1d   : > { %222 = vst.msk [vmem:[#allocation2 + $0x78] sm:$0xff] (!%p2585_p11), %vm205_vm0, %v3772_v1  ;;  %223 = vst.msk [vmem:[#allocation2 + $0x80] sm:$0xff] (!%p2585_p11), %vm205_vm0, %v3772_v1 }
  0x1e   : > { %225 = vst.msk [vmem:[#allocation2 + $0x90] sm:$0xff] %vm205_vm0, %v3772_v1  ;;  %226 = vst.msk [vmem:[#allocation2 + $0x98] sm:$0xff] %vm205_vm0, %v3772_v1 }
  0x1f   : > { %228 = vst.msk [vmem:[#allocation2 + $0xa8] sm:$0xff] %vm205_vm0, %v3772_v1  ;;  %229 = vst.msk [vmem:[#allocation2 + $0xb0] sm:$0xff] %vm205_vm0, %v3772_v1 }
  0x20   : > { %231 = vst.msk [vmem:[#allocation2 + $0xc0] sm:$0xff] %vm205_vm0, %v3772_v1  ;;  %232 = vst.msk [vmem:[#allocation2 + $0xc8] sm:$0xff] %vm205_vm0, %v3772_v1 }
  0x21   : > { %234 = vst.msk [vmem:[#allocation2 + $0xd8] sm:$0xff] %vm205_vm0, %v3772_v1  ;;  %235 = vst.msk [vmem:[#allocation2 + $0xe0] sm:$0xff] %vm205_vm0, %v3772_v1 }
  0x22   : > { %237 = vst.msk [vmem:[#allocation2 + $0xf0] sm:$0xff] %vm205_vm0, %v3772_v1  ;;  %238 = vst.msk [vmem:[#allocation2 + $0xf8] sm:$0xff] %vm205_vm0, %v3772_v1 }
  0x23   : > { %240 = vst.msk [vmem:[#allocation2 + $0x108] sm:$0xff] %vm205_vm0, %v3772_v1  ;;  %241 = vst.msk [vmem:[#allocation2 + $0x110] sm:$0xff] %vm205_vm0, %v3772_v1 }
  0x24   : > { %243 = vst.msk [vmem:[#allocation2 + $0x120] sm:$0xff] %vm205_vm0, %v3772_v1  ;;  %244 = vst.msk [vmem:[#allocation2 + $0x128] sm:$0xff] %vm205_vm0, %v3772_v1 }
  0x25   : > { %246 = vst.msk [vmem:[#allocation2 + $0x138] sm:$0xff] %vm205_vm0, %v3772_v1  ;;  %247 = vst.msk [vmem:[#allocation2 + $0x140] sm:$0xff] %vm205_vm0, %v3772_v1 }
  0x26   : > { %249 = vst.msk [vmem:[#allocation2 + $0x150] sm:$0xff] %vm205_vm0, %v3772_v1  ;;  %250 = vst.msk [vmem:[#allocation2 + $0x158] sm:$0xff] %vm205_vm0, %v3772_v1 }
  0x27   : > { %252 = vst.msk [vmem:[#allocation2 + $0x168] sm:$0xff] %vm205_vm0, %v3772_v1  ;;  %253 = vst.msk [vmem:[#allocation2 + $0x170] sm:$0xff] %vm205_vm0, %v3772_v1 }
  0x28   : > { %255 = vst.msk [vmem:[#allocation2 + $0x180] sm:$0xff] %vm205_vm0, %v3772_v1  ;;  %256 = vst.msk [vmem:[#allocation2 + $0x188] sm:$0xff] %vm205_vm0, %v3772_v1 }
  0x29   : > { %258 = vst.msk [vmem:[#allocation2 + $0x198] sm:$0xff] %vm205_vm0, %v3772_v1  ;;  %259 = vst.msk [vmem:[#allocation2 + $0x1a0] sm:$0xff] %vm205_vm0, %v3772_v1 }
  0x2a   : > { %209 = vst.msk [vmem:[#allocation2 + $0x10] sm:$0x3] %vm208_vm1, %v3772_v1  ;;  %212 = vst.msk [vmem:[#allocation2 + $0x28] sm:$0x3] %vm208_vm1, %v3772_v1 }
  0x2b   : > { %215 = vst.msk [vmem:[#allocation2 + $0x40] sm:$0x3] %vm208_vm1, %v3772_v1  ;;  %218 = vst.msk [vmem:[#allocation2 + $0x58] sm:$0x3] %vm208_vm1, %v3772_v1 }
  0x2c   : > { %221 = vst.msk [vmem:[#allocation2 + $0x70] sm:$0x3] %vm208_vm1, %v3772_v1  ;;  %224 = vst.msk [vmem:[#allocation2 + $0x88] sm:$0x3] %vm208_vm1, %v3772_v1 }
  0x2d   : > { %227 = vst.msk [vmem:[#allocation2 + $0xa0] sm:$0x3] %vm208_vm1, %v3772_v1  ;;  %230 = vst.msk [vmem:[#allocation2 + $0xb8] sm:$0x3] %vm208_vm1, %v3772_v1 }
  0x2e   : > { %233 = vst.msk [vmem:[#allocation2 + $0xd0] sm:$0x3] %vm208_vm1, %v3772_v1  ;;  %236 = vst.msk [vmem:[#allocation2 + $0xe8] sm:$0x3] %vm208_vm1, %v3772_v1 }
  0x2f   : > { %239 = vst.msk [vmem:[#allocation2 + $0x100] sm:$0x3] %vm208_vm1, %v3772_v1  ;;  %242 = vst.msk [vmem:[#allocation2 + $0x118] sm:$0x3] %vm208_vm1, %v3772_v1 }
  0x30   : > { %245 = vst.msk [vmem:[#allocation2 + $0x130] sm:$0x3] %vm208_vm1, %v3772_v1  ;;  %248 = vst.msk [vmem:[#allocation2 + $0x148] sm:$0x3] %vm208_vm1, %v3772_v1 }
  0x31   : > { %251 = vst.msk [vmem:[#allocation2 + $0x160] sm:$0x3] %vm208_vm1, %v3772_v1  ;;  %254 = vst.msk [vmem:[#allocation2 + $0x178] sm:$0x3] %vm208_vm1, %v3772_v1 }
  0x32   : > { %257 = vst.msk [vmem:[#allocation2 + $0x190] sm:$0x3] %vm208_vm1, %v3772_v1  ;;  %260 = vst.msk [vmem:[#allocation2 + $0x1a8] sm:$0x3] %vm208_vm1, %v3772_v1 }
  0x33   : > { %204 = vst.msk [vmem:[#allocation5] sm:$0x3] %vm202_vm2, %v3772_v1 }
  0x34 PF: > { %v2680_v7 = vld [vmem:[%s3869_s7] sm:$0xff]   ;;  %vm326_vm3 = vcmask 31744   ;;  %v2823_v8 = vld [vmem:[%s3869_s7 + $0x8] sm:$0xff]   ;;  %v2824_v13 = vld [vmem:[%s3869_s7 + $0x10] sm:$0xff]   ;;  %s3773_s9 = smov 8   ;;  %s3774_s10 = smov 4  }
  0x35   : > { %v423_v2 = vld [vmem:[#allocation2 + $0x2] sm:$0xff]  ;;  %v424_v3 = vld [vmem:[#allocation2 + $0xa] sm:$0xff]  ;;  %v2681_v10 = vunpack.c.l.bf16 %v2680_v7  ;;  %v2682_v11 = vunpack.c.h.bf16 %v2680_v7  ;;  %v2685_v12 = vunpack.c.l.bf16 %v2823_v8  ;;  %v2825_v14 = vld [vmem:[%s3869_s7 + $0x18] sm:$0xff]   ;;  %v2686_v16 = vunpack.c.h.bf16 %v2823_v8  ;;  %s3775_s11 = smov 12   ;;  %s3776_s12 = smov 16  }
  0x36   : > { %v391_v4 = vld [vmem:[#allocation2 + $0x1] sm:$0xff]  ;;  %v3038_v5 = vpack.i.bf16 %v424_v3, %v423_v2  ;;  %v392_v6 = vld [vmem:[#allocation2 + $0x9] sm:$0xff]  ;;  %v2689_v17 = vunpack.c.l.bf16 %v2824_v13  ;;  %v2690_v18 = vunpack.c.h.bf16 %v2824_v13  ;;  %v2693_v19 = vunpack.c.l.bf16 %v2825_v14  ;;  %v2829_v22 = vld [vmem:[%s3869_s7 + $0x38] sm:$0xff]   ;;  %s3777_s13 = smov 20   ;;  %s3778_s22 = smov 24  }
  0x37   : > { %v3033_v9 = vpack.i.bf16 %v392_v6, %v391_v4  ;;  %v2826_v15 = vld [vmem:[%s3869_s7 + $0x20] sm:$0xff]   ;;  %v2827_v20 = vld [vmem:[%s3869_s7 + $0x28] sm:$0xff]   ;;  %v2828_v21 = vld [vmem:[%s3869_s7 + $0x30] sm:$0xff]   ;;  %327 = vst.msk [vmem:[#allocation2 + $0x19] sm:$0xff] %vm326_vm3, %v2681_v10  ;;  %v2694_v23 = vunpack.c.h.bf16 %v2825_v14  ;;  %v2709_v31 = vunpack.c.l.bf16 %v2829_v22  ;;  %v2710_v32 = vunpack.c.h.bf16 %v2829_v22  ;;  %s3779_s5 = smov 28   ;;  %s3780_s6 = smov 32  }
  0x38   : > { %3039 = vrot.lane.b32.xlu1 %v3038_v5, %s3773_s9  ;;  %328 = vst.msk [vmem:[#allocation2 + $0x21] sm:$0xff] %vm326_vm3, %v2682_v11  ;;  %329 = vst.msk [vmem:[#allocation2 + $0x31] sm:$0xff] %vm326_vm3, %v2685_v12  ;;  %v2697_v24 = vunpack.c.l.bf16 %v2826_v15  ;;  %v2698_v25 = vunpack.c.h.bf16 %v2826_v15  ;;  %v2701_v26 = vunpack.c.l.bf16 %v2827_v20  ;;  %v2830_v27 = vld [vmem:[%s3869_s7 + $0x40] sm:$0xff]   ;;  %v2702_v28 = vunpack.c.h.bf16 %v2827_v20  ;;  %v2831_v35 = vld [vmem:[%s3869_s7 + $0x48] sm:$0xff]   ;;  %s2494_s20 = sshll.u32 %s3871_s8, 4  ;;  %s3782_s28 = smov [#allocation3]   ;;  %s4782_s20 = int_to_ptr.vmem [resolvable:$true] %s2494_s20 }
  0x39   : > { %3034 = vrot.lane.b32.xlu0 %v3033_v9, %s3774_s10  ;;  %330 = vst.msk [vmem:[#allocation2 + $0x39] sm:$0xff] %vm326_vm3, %v2686_v16  ;;  %331 = vst.msk [vmem:[#allocation2 + $0x49] sm:$0xff] %vm326_vm3, %v2689_v17  ;;  %v2705_v29 = vunpack.c.l.bf16 %v2828_v21  ;;  %v2706_v30 = vunpack.c.h.bf16 %v2828_v21  ;;  %v2713_v33 = vunpack.c.l.bf16 %v2830_v27  ;;  %v2714_v34 = vunpack.c.h.bf16 %v2830_v27  ;;  %v3673_v61 = vld [vmem:[%s4851_s1] sm:$0xff]   ;;  %v3674_v63 = vld [vmem:[%s4851_s1 + $0x8] sm:$0xff]   ;;  %s3678_s23 = scalar_lea.vmem %s4782_s20, 2048  ;;  %s3682_s29 = sshll.u32 %s3782_s28, 4  ;;  %s3683_s29 = int_to_ptr.vmem [resolvable:$false] %s3682_s29 }
  0x3a   : > { %332 = vst.msk [vmem:[#allocation2 + $0x51] sm:$0xff] %vm326_vm3, %v2690_v18  ;;  %333 = vst.msk [vmem:[#allocation2 + $0x61] sm:$0xff] %vm326_vm3, %v2693_v19  ;;  %v2717_v36 = vunpack.c.l.bf16 %v2831_v35  ;;  %v2718_v37 = vunpack.c.h.bf16 %v2831_v35  ;;  %2872 = vmatprep.subr.bf16.mxu0 %v3673_v61  ;;  %v2832_v0 = vld [vmem:[%s3869_s7 + $0x50] sm:$0xff]   ;;  %vm2027_vm4 = vcmask 1041408   ;;  %v2833_v7 = vld [vmem:[%s3869_s7 + $0x58] sm:$0xff]   ;;  %vm1704_vm5 = vcmask 64512   ;;  %p3679_p12 = scmp.ne.s32.totalorder %s4782_s20, %s3678_s23  ;;  %p3685_p1 = scmp.lt.s32.totalorder %s4782_s20, %s3683_s29 }
  0x3b   : > { %334 = vst.msk [vmem:[#allocation2 + $0x69] sm:$0xff] %vm326_vm3, %v2694_v23  ;;  %335 = vst.msk [vmem:[#allocation2 + $0x79] sm:$0xff] %vm326_vm3, %v2697_v24  ;;  %2873 = vmatpush3.bf16.msra.mxu0 %v3673_v61  ;;  %v3675_v1 = vld [vmem:[%s4851_s1 + $0x10] ss:$0 sps:$4 sm:$0x33]   ;;  %v2721_v2 = vunpack.c.l.bf16 %v2832_v0  ;;  %v2722_v3 = vunpack.c.h.bf16 %v2832_v0  ;;  %v2725_v9 = vunpack.c.l.bf16 %v2833_v7  ;;  %v2726_v10 = vunpack.c.h.bf16 %v2833_v7  ;;  %v2834_v17 = vld [vmem:[%s3869_s7 + $0x60] sm:$0xff]  }
  0x3c   : > { %336 = vst.msk [vmem:[#allocation2 + $0x81] sm:$0xff] %vm326_vm3, %v2698_v25  ;;  %337 = vst.msk [vmem:[#allocation2 + $0x91] sm:$0xff] %vm326_vm3, %v2701_v26  ;;  %2874 = vmatprep.subr.bf16.mxu0 %v3674_v63  ;;  %v2029_v6 = vsel %vm2027_vm4, %v3675_v1, 0  ;;  %v2729_v20 = vunpack.c.l.bf16 %v2834_v17  ;;  %v2730_v21 = vunpack.c.h.bf16 %v2834_v17  ;;  %v2837_v61 = vld [vmem:[%s3869_s7 + $0x78] sm:$0xff]   ;;  %vm1737_vm6 = vcmask 97280   ;;  %p3680_p13 = pnand %p3679_p12, %p3851_p5  ;;  %s3684_s30 = scalar_lea.vmem %s3683_s29, 4096 }
  0x3d   : > { %338 = vst.msk [vmem:[#allocation2 + $0x99] sm:$0xff] %vm326_vm3, %v2702_v28  ;;  %339 = vst.msk [vmem:[#allocation2 + $0xa9] sm:$0xff] %vm326_vm3, %v2705_v29  ;;  %v2742_v0 = vunpack.c.h.bf16 %v2837_v61  ;;  %vm1770_vm7 = vcmask 130048   ;;  %vm1803_vm8 = vcmask 162816   ;;  %vm1836_vm9 = vcmask 195584   ;;  %p3686_p3 = scmp.lt.s32.totalorder %s3684_s30, %s3678_s23 }
  0x3e   : > { %340 = vst.msk [vmem:[#allocation2 + $0xb1] sm:$0xff] %vm326_vm3, %v2706_v30  ;;  %341 = vst.msk [vmem:[#allocation2 + $0xc1] sm:$0xff] %vm326_vm3, %v2709_v31  ;;  %v393_v40 = vld [vmem:[#allocation2 + $0x19] sm:$0xff]  ;;  %v2835_v31 = vld [vmem:[%s3869_s7 + $0x68] sm:$0xff]   ;;  %vm1869_vm10 = vcmask 228352   ;;  %vm1902_vm11 = vcmask 261120   ;;  %p3681_p0 = pneg %p3680_p13 }
  0x3f   : > { %342 = vst.msk [vmem:[#allocation2 + $0xc9] sm:$0xff] %vm326_vm3, %v2710_v32  ;;  %343 = vst.msk [vmem:[#allocation2 + $0xd9] sm:$0xff] %vm326_vm3, %v2713_v33  ;;  %v425_v38 = vld [vmem:[#allocation2 + $0x1a] sm:$0xff]  ;;  %v426_v39 = vld [vmem:[#allocation2 + $0x22] sm:$0xff]  ;;  %2875 = vmatpush3.bf16.msra.mxu0 %v3674_v63  ;;  %v2733_v33 = vunpack.c.l.bf16 %v2835_v31  ;;  %v2741_v63 = vunpack.c.l.bf16 %v2837_v61  ;;  %vm1978_vm12 = vcmask 293888   ;;  %p3687_p4 = por %p3686_p3, %p3685_p1 }
  0x40   : > { %344 = vst.msk [vmem:[#allocation2 + $0xe1] sm:$0xff] %vm326_vm3, %v2714_v34  ;;  %345 = vst.msk [vmem:[#allocation2 + $0xf1] sm:$0xff] %vm326_vm3, %v2717_v36  ;;  %v3048_v41 = vpack.i.bf16 %v426_v39, %v425_v38  ;;  %v394_v42 = vld [vmem:[#allocation2 + $0x21] sm:$0xff]  ;;  %v3960_v43 = vld [vmem:[#allocation2 + $0x30] sm:$0xff]  ;;  %2974 = vmatprep.subr.msk.bf16.mxu0 %vm2027_vm4, %v3675_v1  ;;  %v2734_v34 = vunpack.c.h.bf16 %v2835_v31 }
  0x41   : > { %346 = vst.msk [vmem:[#allocation2 + $0xf9] sm:$0xff] %vm326_vm3, %v2718_v37  ;;  %v3962_v44 = vld [vmem:[#allocation2 + $0x38] sm:$0xff]  ;;  %v3043_v45 = vpack.i.bf16 %v394_v42, %v393_v40  ;;  %v3966_v47 = vld [vmem:[#allocation2 + $0x20] sm:$0xff]  ;;  %v3978_v56 = vld [vmem:[#allocation2 + $0x48] sm:$0xff]  ;;  %p3688_p7 = pnand %p3687_p4, %p3681_p0 }
  0x42   : > { %v3964_v46 = vld [vmem:[#allocation2 + $0x18] sm:$0xff]  ;;  %3049 = vrot.lane.b32.xlu1 %v3048_v41, %s3773_s9  ;;  %v3058_v48 = vpack.i.bf16 %v3962_v44, %v3960_v43  ;;  %v3980_v57 = vld [vmem:[#allocation2 + $0x50] sm:$0xff]  ;;  %347 = vst.msk [vmem:[#allocation2 + $0x109] sm:$0xff] %vm326_vm3, %v2721_v2  ;;  %348 = vst.msk [vmem:[#allocation2 + $0x111] sm:$0xff] %vm326_vm3, %v2722_v3 }
  0x43   : > { %3044 = vrot.lane.b32.xlu0 %v3043_v45, %s3774_s10  ;;  %v3053_v49 = vpack.i.bf16 %v3966_v47, %v3964_v46  ;;  %v489_v50 = vld [vmem:[#allocation2 + $0x31] sm:$0xff]  ;;  %v490_v51 = vld [vmem:[#allocation2 + $0x39] sm:$0xff]  ;;  %v3088_v58 = vpack.i.bf16 %v3980_v57, %v3978_v56  ;;  %v586_v59 = vld [vmem:[#allocation2 + $0x49] sm:$0xff]  ;;  %2877 = vmatpush3.bf16.msra.mxu0 %v2029_v6  ;;  %349 = vst.msk [vmem:[#allocation2 + $0x121] sm:$0xff] %vm326_vm3, %v2725_v9 }
  0x44   : > { %v3068_v52 = vpack.i.bf16 %v490_v51, %v489_v50  ;;  %v521_v53 = vld [vmem:[#allocation2 + $0x32] sm:$0xff]  ;;  %v522_v54 = vld [vmem:[#allocation2 + $0x3a] sm:$0xff]  ;;  %v618_v4 = vld [vmem:[#allocation2 + $0x4a] sm:$0xff]  ;;  %350 = vst.msk [vmem:[#allocation2 + $0x129] sm:$0xff] %vm326_vm3, %v2726_v10 }
  0x45   : > { %v3078_v55 = vpack.i.bf16 %v522_v54, %v521_v53  ;;  %v587_v60 = vld [vmem:[#allocation2 + $0x51] sm:$0xff]  ;;  %v4009_v11 = vld [vmem:[#allocation2 + $0x60] sm:$0xff]  ;;  %v4011_v12 = vld [vmem:[#allocation2 + $0x68] sm:$0xff]  ;;  %351 = vst.msk [vmem:[#allocation2 + $0x139] sm:$0xff] %vm326_vm3, %v2729_v20 }
  0x46   : > { %3059 = vrot.lane.b32.xlu1 %v3058_v48, %s3775_s11  ;;  %v3098_v62 = vpack.i.bf16 %v587_v60, %v586_v59  ;;  %v619_v5 = vld [vmem:[#allocation2 + $0x52] sm:$0xff]  ;;  %v3138_v13 = vpack.i.bf16 %v4011_v12, %v4009_v11  ;;  %v493_v14 = vld [vmem:[#allocation2 + $0x61] sm:$0xff]  ;;  %v494_v15 = vld [vmem:[#allocation2 + $0x69] sm:$0xff]  ;;  %352 = vst.msk [vmem:[#allocation2 + $0x141] sm:$0xff] %vm326_vm3, %v2730_v21 }
  0x47   : > { %3054 = vrot.lane.b32.xlu0 %v3053_v49, %s3775_s11  ;;  %v3113_v8 = vpack.i.bf16 %v619_v5, %v618_v4  ;;  %v3148_v16 = vpack.i.bf16 %v494_v15, %v493_v14  ;;  %v525_v18 = vld [vmem:[#allocation2 + $0x62] sm:$0xff]  ;;  %v526_v19 = vld [vmem:[#allocation2 + $0x6a] sm:$0xff]  ;;  %v4024_v23 = vld [vmem:[#allocation2 + $0x78] sm:$0xff]  ;;  %353 = vst.msk [vmem:[#allocation2 + $0x151] sm:$0xff] %vm326_vm3, %v2733_v33 }
  0x48   : > { %v3158_v22 = vpack.i.bf16 %v526_v19, %v525_v18  ;;  %v4026_v24 = vld [vmem:[#allocation2 + $0x80] sm:$0xff]  ;;  %354 = vst.msk [vmem:[#allocation2 + $0x159] sm:$0xff] %vm326_vm3, %v2734_v34  ;;  %v465_v35 = vld [vmem:[#allocation2 + $0x90] sm:$0xff]  ;;  %v466_v36 = vld [vmem:[#allocation2 + $0x98] sm:$0xff] }
  0x49   : > { %v3168_v25 = vpack.i.bf16 %v4026_v24, %v4024_v23  ;;  %v590_v26 = vld [vmem:[#allocation2 + $0x79] sm:$0xff]  ;;  %v591_v27 = vld [vmem:[#allocation2 + $0x81] sm:$0xff]  ;;  %v3218_v37 = vpack.i.bf16 %v466_v36, %v465_v35  ;;  %v497_v38 = vld [vmem:[#allocation2 + $0x91] sm:$0xff]  ;;  %357 = vst.msk [vmem:[#allocation2 + $0x181] sm:$0xff] %vm326_vm3, %v2741_v63 }
  0x4a   : > { %3069 = vrot.lane.b32.xlu1 %v3068_v52, %s3776_s12  ;;  %v3178_v28 = vpack.i.bf16 %v591_v27, %v590_v26  ;;  %v622_v29 = vld [vmem:[#allocation2 + $0x7a] sm:$0xff]  ;;  %v623_v30 = vld [vmem:[#allocation2 + $0x82] sm:$0xff]  ;;  %v529_v42 = vld [vmem:[#allocation2 + $0x92] sm:$0xff]  ;;  %358 = vst.msk [vmem:[#allocation2 + $0x189] sm:$0xff] %vm326_vm3, %v2742_v0 }
  0x4b   : > { %3064 = vrot.lane.b32.xlu0 %v3043_v45, %s3776_s12  ;;  %v3193_v32 = vpack.i.bf16 %v623_v30, %v622_v29  ;;  %v498_v39 = vld [vmem:[#allocation2 + $0x99] sm:$0xff]  ;;  %v562_v51 = vld [vmem:[#allocation2 + $0xa8] sm:$0xff]  ;;  %v473_v31 = vld [vmem:[#allocation2 + $0xf0] sm:$0xff] }
  0x4c   : > { %v3228_v40 = vpack.i.bf16 %v498_v39, %v497_v38  ;;  %v530_v45 = vld [vmem:[#allocation2 + $0x9a] sm:$0xff]  ;;  %v594_v54 = vld [vmem:[#allocation2 + $0xa9] sm:$0xff]  ;;  %v627_v60 = vld [vmem:[#allocation2 + $0xb2] sm:$0xff] }
  0x4d   : > { %v3238_v50 = vpack.i.bf16 %v530_v45, %v529_v42  ;;  %v626_v59 = vld [vmem:[#allocation2 + $0xaa] sm:$0xff]  ;;  %v469_v1 = vld [vmem:[#allocation2 + $0xc0] sm:$0xff]  ;;  %v566_v10 = vld [vmem:[#allocation2 + $0xd8] sm:$0xff] }
  0x4e   : > { %3079 = vrot.lane.b32.xlu1 %v3078_v55, %s3777_s13  ;;  %v470_v2 = vld [vmem:[#allocation2 + $0xc8] sm:$0xff]  ;;  %v598_v17 = vld [vmem:[#allocation2 + $0xd9] sm:$0xff] }
  0x4f   : > { %3074 = vrot.lane.b32.xlu0 %v3048_v41, %s3777_s13  ;;  %v2836_v41 = vld [vmem:[%s3869_s7 + $0x70] sm:$0xff]   ;;  %v3298_v3 = vpack.i.bf16 %v470_v2, %v469_v1  ;;  %v501_v4 = vld [vmem:[#allocation2 + $0xc1] sm:$0xff] }
  0x50   : > { %v2738_v49 = vunpack.c.h.bf16 %v2836_v41  ;;  %v502_v5 = vld [vmem:[#allocation2 + $0xc9] sm:$0xff]  ;;  %v599_v18 = vld [vmem:[#allocation2 + $0xe1] sm:$0xff] }
  0x51   : > { %v3308_v6 = vpack.i.bf16 %v502_v5, %v501_v4  ;;  %v533_v7 = vld [vmem:[#allocation2 + $0xc2] sm:$0xff]  ;;  %v4079_v19 = vpack.i.bf16 %v599_v18, %v598_v17 }
  0x52   : > { %3089 = vrot.lane.b32.xlu1 %v3088_v58, %s3778_s22  ;;  %356 = vst.msk [vmem:[#allocation2 + $0x171] sm:$0xff] %vm326_vm3, %v2738_v49  ;;  %v631_v26 = vld [vmem:[#allocation2 + $0xe2] sm:$0xff]  ;;  %v506_v49 = vld [vmem:[#allocation2 + $0xf9] sm:$0xff] }
  0x53   : > { %3084 = vrot.lane.b32.xlu0 %v3058_v48, %s3778_s22  ;;  %v2737_v48 = vunpack.c.l.bf16 %v2836_v41  ;;  %v359_v36 = vld [vmem:[#allocation2] sm:$0xff] }
  0x55   : > { %355 = vst.msk [vmem:[#allocation2 + $0x169] sm:$0xff] %vm326_vm3, %v2737_v48  ;;  %v505_v48 = vld [vmem:[#allocation2 + $0xf1] sm:$0xff] }
  0x56   : > { %3099 = vrot.lane.b32.xlu1 %v3098_v62, %s3779_s5  ;;  %v4130_v4 = vpack.i.bf16 %v506_v49, %v505_v48  ;;  %v602_v49 = vld [vmem:[#allocation2 + $0x109] sm:$0xff] }
  0x57   : > { %3094 = vrot.lane.b32.xlu0 %v3068_v52, %s3779_s5 }
  0x5a   : > { %3109 = vrot.lane.b32.xlu1 %v3068_v52, %s3774_s10  ;;  %v563_v52 = vld [vmem:[#allocation2 + $0xb0] sm:$0xff] }
  0x5b   : > { %3104 = vrot.lane.b32.xlu0 %v3078_v55, %s3780_s6  ;;  %v3248_v53 = vpack.i.bf16 %v563_v52, %v562_v51 }
  0x5e   : > { %3119 = vrot.lane.b32.xlu1 %v3098_v62, %s3774_s10 }
  0x5f   : > { %3114 = vrot.lane.b32.xlu0 %v3113_v8, %s3780_s6 }
  0x62   : > { %3129 = vrot.lane.b32.xlu1 %v3113_v8, %s3773_s9 }
  0x63   : > { %3124 = vrot.lane.b32.xlu0 %v3078_v55, %s3773_s9  ;;  %v595_v55 = vld [vmem:[#allocation2 + $0xb1] sm:$0xff] }
  0x66   : > { %3139 = vrot.lane.b32.xlu1 %v3138_v13, %s3775_s11 }
  0x67   : > { %3134 = vrot.lane.b32.xlu0 %v3088_v58, %s3775_s11  ;;  %v3258_v58 = vpack.i.bf16 %v595_v55, %v594_v54 }
  0x6a   : > { %3149 = vrot.lane.b32.xlu1 %v3148_v16, %s3776_s12 }
  0x6b   : > { %3144 = vrot.lane.b32.xlu0 %v3098_v62, %s3776_s12  ;;  %v3273_v62 = vpack.i.bf16 %v627_v60, %v626_v59  ;;  %v570_v59 = vld [vmem:[#allocation2 + $0x108] sm:$0xff]  ;;  %v571_v60 = vld [vmem:[#allocation2 + $0x110] sm:$0xff] }
  0x6e   : > { %3159 = vrot.lane.b32.xlu1 %v3158_v22, %s3777_s13 }
  0x6f   : > { %3154 = vrot.lane.b32.xlu0 %v3113_v8, %s3777_s13  ;;  %v534_v8 = vld [vmem:[#allocation2 + $0xca] sm:$0xff] }
  0x70   : > { %v3318_v9 = vpack.i.bf16 %v534_v8, %v533_v7 }
  0x72   : > { %3169 = vrot.lane.b32.xlu1 %v3168_v25, %s3778_s22 }
  0x73   : > { %3164 = vrot.lane.b32.xlu0 %v3138_v13, %s3778_s22  ;;  %v567_v13 = vld [vmem:[#allocation2 + $0xe0] sm:$0xff] }
  0x74   : > { %v4074_v15 = vpack.i.bf16 %v567_v13, %v566_v10 }
  0x76   : > { %3179 = vrot.lane.b32.xlu1 %v3178_v28, %s3779_s5 }
  0x77   : > { %3174 = vrot.lane.b32.xlu0 %v3148_v16, %s3779_s5 }
  0x7a   : > { %3189 = vrot.lane.b32.xlu1 %v3148_v16, %s3774_s10 }
  0x7b   : > { %3184 = vrot.lane.b32.xlu0 %v3158_v22, %s3780_s6 }
  0x7e   : > { %3199 = vrot.lane.b32.xlu1 %v3178_v28, %s3774_s10 }
  0x7f   : > { %3194 = vrot.lane.b32.xlu0 %v3193_v32, %s3780_s6 }
  0x82   : > { %3209 = vrot.lane.b32.xlu1 %v3193_v32, %s3773_s9 }
  0x83   : > { %3204 = vrot.lane.b32.xlu0 %v3158_v22, %s3773_s9 }
  0x86   : > { %3219 = vrot.lane.b32.xlu1 %v3218_v37, %s3775_s11 }
  0x87   : > { %3214 = vrot.lane.b32.xlu0 %v3168_v25, %s3775_s11  ;;  %v630_v25 = vld [vmem:[#allocation2 + $0xda] sm:$0xff] }
  0x8a   : > { %3229 = vrot.lane.b32.xlu1 %v3228_v40, %s3776_s12 }
  0x8b   : > { %3224 = vrot.lane.b32.xlu0 %v3178_v28, %s3776_s12  ;;  %v4093_v28 = vpack.i.bf16 %v631_v26, %v630_v25 }
  0x8e   : > { %3239 = vrot.lane.b32.xlu1 %v3238_v50, %s3777_s13 }
  0x8f   : > { %3234 = vrot.lane.b32.xlu0 %v3193_v32, %s3777_s13  ;;  %v474_v32 = vld [vmem:[#allocation2 + $0xf8] sm:$0xff] }
  0x90   : > { %v4109_v41 = vpack.i.bf16 %v474_v32, %v473_v31 }
  0x92   : > { %3249 = vrot.lane.b32.xlu1 %v3248_v53, %s3778_s22 }
  0x93   : > { %3244 = vrot.lane.b32.xlu0 %v3218_v37, %s3778_s22  ;;  %v360_v37 = vld [vmem:[#allocation2 + $0x8] sm:$0xff] }
  0x96   : > { %3259 = vrot.lane.b32.xlu1 %v3258_v58, %s3779_s5 }
  0x97   : > { %3254 = vrot.lane.b32.xlu0 %v3228_v40, %s3779_s5 }
  0x9a   : > { %3269 = vrot.lane.b32.xlu1 %v3228_v40, %s3774_s10 }
  0x9b   : > { %3264 = vrot.lane.b32.xlu0 %v3238_v50, %s3780_s6 }
  0x9e   : > { %3279 = vrot.lane.b32.xlu1 %v3258_v58, %s3774_s10 }
  0x9f   : > { %3274 = vrot.lane.b32.xlu0 %v3273_v62, %s3780_s6 }
  0xa2   : > { %3289 = vrot.lane.b32.xlu1 %v3273_v62, %s3773_s9 }
  0xa3   : > { %3284 = vrot.lane.b32.xlu0 %v3238_v50, %s3773_s9  ;;  %v537_v50 = vld [vmem:[#allocation2 + $0xf2] sm:$0xff] }
  0xa6   : > { %3299 = vrot.lane.b32.xlu1 %v3298_v3, %s3775_s11 }
  0xa7   : > { %3294 = vrot.lane.b32.xlu0 %v3248_v53, %s3775_s11 }
  0xaa   : > { %3309 = vrot.lane.b32.xlu1 %v3308_v6, %s3776_s12  ;;  %v4072_v14 = vpop.permute.xlu1 %3039 }
  0xab   : > { %3304 = vrot.lane.b32.xlu0 %v3258_v58, %s3776_s12  ;;  %v3035_v16 = vpop.permute.xlu0 %3034  ;;  %v3042_v42 = vunpack.i.h.bf16 %v4072_v14  ;;  %v3041_v45 = vunpack.i.l.bf16 %v4072_v14  ;;  %v538_v58 = vld [vmem:[#allocation2 + $0xfa] sm:$0xff] }
  0xac   : > { %v3037_v33 = vunpack.i.h.bf16 %v3035_v16  ;;  %v3036_v34 = vunpack.i.l.bf16 %v3035_v16 }
  0xae   : > { %3319 = vrot.lane.b32.xlu1 %v3318_v9, %s3777_s13  ;;  %v1672_v51 = vsel %vm326_vm3, %v359_v36, %v3036_v34  ;;  %v1673_v52 = vsel %vm326_vm3, %v360_v37, %v3037_v33 }
  0xaf   : > { %3314 = vrot.lane.b32.xlu0 %v3273_v62, %s3777_s13  ;;  %v1706_v5 = vsel %vm1704_vm5, %v1673_v52, %v3042_v42 }
  0xb2   : > { %3329 = vrot.lane.b32.xlu1 %v4074_v15, %s3778_s22 }
  0xb3   : > { %3324 = vrot.lane.b32.xlu0 %v3298_v3, %s3778_s22 }
  0xb4   : > { %v4082_v20 = vpop.permute.xlu1 %3049 }
  0xb5   : > { %v3045_v21 = vpop.permute.xlu0 %3044  ;;  %v3052_v53 = vunpack.i.h.bf16 %v4082_v20  ;;  %v3051_v54 = vunpack.i.l.bf16 %v4082_v20 }
  0xb6   : > { %3339 = vrot.lane.b32.xlu1 %v4079_v19, %s3779_s5  ;;  %v3047_v38 = vunpack.i.h.bf16 %v3045_v21  ;;  %v3046_v39 = vunpack.i.l.bf16 %v3045_v21 }
  0xb7   : > { %3334 = vrot.lane.b32.xlu0 %v3308_v6, %s3779_s5 }
  0xb8   : > { %v4087_v22 = vpop.permute.xlu1 %3059  ;;  %v1674_v61 = vsel %vm326_vm3, %v3964_v46, %v3046_v39  ;;  %v1675_v62 = vsel %vm326_vm3, %v3966_v47, %v3047_v38  ;;  %v1705_v46 = vsel %vm1704_vm5, %v1672_v51, %v3041_v45  ;;  %v4136_v47 = vpack.i.bf16 %v538_v58, %v537_v50  ;;  %v603_v50 = vld [vmem:[#allocation2 + $0x111] sm:$0xff] }
  0xb9   : > { %v4089_v27 = vpop.permute.xlu0 %3054  ;;  %v3062_v63 = vunpack.i.h.bf16 %v4087_v22  ;;  %v3061_v0 = vunpack.i.l.bf16 %v4087_v22  ;;  %v1707_v7 = vsel %vm1704_vm5, %v1674_v61, %v3051_v54  ;;  %v1708_v8 = vsel %vm1704_vm5, %v1675_v62, %v3052_v53 }
  0xba   : > { %3349 = vrot.lane.b32.xlu1 %v3308_v6, %s3774_s10  ;;  %v3057_v2 = vunpack.i.h.bf16 %v4089_v27  ;;  %v3056_v3 = vunpack.i.l.bf16 %v4089_v27  ;;  %v4138_v6 = vpack.i.bf16 %v571_v60, %v570_v59 }
  0xbb   : > { %3344 = vrot.lane.b32.xlu0 %v3318_v9, %s3780_s6  ;;  %v1740_v14 = vsel %vm1737_vm6, %v1707_v7, %v3061_v0  ;;  %v1741_v16 = vsel %vm1737_vm6, %v1708_v8, %v3062_v63 }
  0xbc   : > { %v4095_v29 = vpop.permute.xlu1 %3069  ;;  %v1739_v20 = vsel %vm1737_vm6, %v1706_v5, %v3057_v2  ;;  %v1738_v21 = vsel %vm1737_vm6, %v1705_v46, %v3056_v3 }
  0xbd   : > { %v4097_v30 = vpop.permute.xlu0 %3064  ;;  %v3072_v26 = vunpack.i.h.bf16 %v4095_v29  ;;  %v3071_v27 = vunpack.i.l.bf16 %v4095_v29 }
  0xbe   : > { %3359 = vrot.lane.b32.xlu1 %v4079_v19, %s3774_s10  ;;  %v3066_v10 = vunpack.i.l.bf16 %v4097_v30 }
  0xbf   : > { %3354 = vrot.lane.b32.xlu0 %v4093_v28, %s3780_s6  ;;  %v1774_v58 = vsel %vm1770_vm7, %v1741_v16, %v3072_v26  ;;  %v478_v26 = vld [vmem:[#allocation2 + $0x128] sm:$0xff] }
  0xc0   : > { %v4103_v35 = vpop.permute.xlu1 %3079  ;;  %v1771_v32 = vsel %vm1770_vm7, %v1738_v21, %v3066_v10 }
  0xc1   : > { %v4105_v40 = vpop.permute.xlu0 %3074  ;;  %v3082_v34 = vunpack.i.h.bf16 %v4103_v35  ;;  %v3081_v36 = vunpack.i.l.bf16 %v4103_v35 }
  0xc2   : > { %3369 = vrot.lane.b32.xlu1 %v4093_v28, %s3773_s9  ;;  %v3076_v17 = vunpack.i.l.bf16 %v4105_v40 }
  0xc3   : > { %3364 = vrot.lane.b32.xlu0 %v3318_v9, %s3773_s9  ;;  %v3067_v9 = vunpack.i.h.bf16 %v4097_v30  ;;  %v1807_v63 = vsel %vm1803_vm8, %v1774_v58, %v3082_v34 }
  0xc4   : > { %v4118_v55 = vpop.permute.xlu1 %3089  ;;  %v1804_v38 = vsel %vm1803_vm8, %v1771_v32, %v3076_v17  ;;  %v634_v17 = vld [vmem:[#allocation2 + $0x10a] sm:$0xff]  ;;  %v541_v32 = vld [vmem:[#allocation2 + $0x122] sm:$0xff] }
  0xc5   : > { %v3085_v1 = vpop.permute.xlu0 %3084  ;;  %v1772_v33 = vsel %vm1770_vm7, %v1739_v20, %v3067_v9  ;;  %v3092_v29 = vunpack.i.h.bf16 %v4118_v55 }
  0xc6   : > { %3379 = vrot.lane.b32.xlu1 %v4109_v41, %s3775_s11  ;;  %v3087_v22 = vunpack.i.h.bf16 %v3085_v1  ;;  %v3086_v25 = vunpack.i.l.bf16 %v3085_v1  ;;  %v4182_v1 = vpack.i.bf16 %v603_v50, %v602_v49 }
  0xc7   : > { %3374 = vrot.lane.b32.xlu0 %v4074_v15, %s3775_s11  ;;  %v3077_v15 = vunpack.i.h.bf16 %v4105_v40  ;;  %v3091_v40 = vunpack.i.l.bf16 %v4118_v55  ;;  %v1773_v55 = vsel %vm1770_vm7, %v1740_v14, %v3071_v27  ;;  %v1840_v3 = vsel %vm1836_vm9, %v1807_v63, %v3092_v29  ;;  %v575_v29 = vld [vmem:[#allocation2 + $0x140] sm:$0xff] }
  0xc8   : > { %v3100_v13 = vpop.permute.xlu1 %3099  ;;  %v1837_v48 = vsel %vm1836_vm9, %v1804_v38, %v3086_v25  ;;  %v1806_v62 = vsel %vm1803_vm8, %v1773_v55, %v3081_v36  ;;  %v477_v25 = vld [vmem:[#allocation2 + $0x120] sm:$0xff]  ;;  %v542_v38 = vld [vmem:[#allocation2 + $0x12a] sm:$0xff] }
  0xc9   : > { %v3095_v18 = vpop.permute.xlu0 %3094  ;;  %v1805_v39 = vsel %vm1803_vm8, %v1772_v33, %v3077_v15  ;;  %v3102_v51 = vunpack.i.h.bf16 %v3100_v13  ;;  %v3101_v52 = vunpack.i.l.bf16 %v3100_v13  ;;  %v1839_v2 = vsel %vm1836_vm9, %v1806_v62, %v3091_v40 }
  0xca   : > { %3389 = vrot.lane.b32.xlu1 %v4130_v4, %s3776_s12  ;;  %v3097_v30 = vunpack.i.h.bf16 %v3095_v18  ;;  %v3096_v31 = vunpack.i.l.bf16 %v3095_v18  ;;  %v1838_v35 = vsel %vm1836_vm9, %v1805_v39, %v3087_v22  ;;  %v4222_v36 = vpack.i.bf16 %v478_v26, %v477_v25  ;;  %v574_v39 = vld [vmem:[#allocation2 + $0x138] sm:$0xff] }
  0xcb   : > { %3384 = vrot.lane.b32.xlu0 %v4079_v19, %s3776_s12  ;;  %v1872_v7 = vsel %vm1869_vm10, %v1839_v2, %v3101_v52  ;;  %v1873_v8 = vsel %vm1869_vm10, %v1840_v3, %v3102_v51  ;;  %v4234_v55 = vpack.i.bf16 %v575_v29, %v574_v39 }
  0xcc   : > { %v4160_v37 = vpop.permute.xlu1 %3109  ;;  %v1870_v53 = vsel %vm1869_vm10, %v1837_v48, %v3096_v31  ;;  %v1871_v54 = vsel %vm1869_vm10, %v1838_v35, %v3097_v30  ;;  %v509_v30 = vld [vmem:[#allocation2 + $0x121] sm:$0xff]  ;;  %v510_v31 = vld [vmem:[#allocation2 + $0x129] sm:$0xff] }
  0xcd   : > { %v3105_v42 = vpop.permute.xlu0 %3104  ;;  %v3112_v40 = vunpack.i.h.bf16 %v4160_v37  ;;  %v4230_v50 = vpack.i.bf16 %v510_v31, %v509_v30 }
  0xce   : > { %v3107_v19 = vunpack.i.h.bf16 %v3105_v42  ;;  %v3106_v45 = vunpack.i.l.bf16 %v3105_v42  ;;  %3399 = vrot.lane.b32.xlu1 %v4136_v47, %s3777_s13  ;;  %v3111_v42 = vunpack.i.l.bf16 %v4160_v37 }
  0xcf   : > { %3394 = vrot.lane.b32.xlu0 %v4093_v28, %s3777_s13 }
  0xd0   : > { %v4176_v59 = vpop.permute.xlu1 %3119  ;;  %v1903_v60 = vsel %vm1902_vm11, %v1870_v53, %v3106_v45  ;;  %v1904_v61 = vsel %vm1902_vm11, %v1871_v54, %v3107_v19  ;;  %v4232_v54 = vpack.i.bf16 %v542_v38, %v541_v32 }
  0xd1   : > { %v3115_v0 = vpop.permute.xlu0 %3114  ;;  %v1935_v28 = vpack.c.bf16 %v1904_v61, %v1903_v60  ;;  %v3122_v33 = vunpack.i.h.bf16 %v4176_v59  ;;  %v3121_v34 = vunpack.i.l.bf16 %v4176_v59  ;;  %v1677_v60 = vsel %vm326_vm3, %v3962_v44, %v3112_v40 }
  0xd2   : > { %v3117_v46 = vunpack.i.h.bf16 %v3115_v0  ;;  %v3116_v5 = vunpack.i.l.bf16 %v3115_v0  ;;  %3409 = vrot.lane.b32.xlu1 %v4138_v6, %s3778_s22  ;;  %v1676_v61 = vsel %vm326_vm3, %v3960_v43, %v3111_v42 }
  0xd3   : > { %3404 = vrot.lane.b32.xlu0 %v4109_v41, %s3778_s22  ;;  %2878 = vmatprep.mubr.msk.bf16.mxu0 %vm1978_vm12, %v1935_v28  ;;  %v635_v41 = vld [vmem:[#allocation2 + $0x112] sm:$0xff]  ;;  %v1679_v37 = vsel %vm326_vm3, %v3980_v57, %v3122_v33  ;;  %v1678_v58 = vsel %vm326_vm3, %v3978_v56, %v3121_v34  ;;  %v607_v34 = vld [vmem:[#allocation2 + $0x141] sm:$0xff] }
  0xd4   : > { %v1905_v9 = vsel %vm1902_vm11, %v1872_v7, %v3116_v5  ;;  %v1906_v10 = vsel %vm1902_vm11, %v1873_v8, %v3117_v46  ;;  %v3130_v13 = vpop.permute.xlu1 %3129  ;;  %v4204_v20 = vpack.i.bf16 %v635_v41, %v634_v17 }
  0xd5   : > { %v3125_v14 = vpop.permute.xlu0 %3124  ;;  %v1936_v16 = vpack.c.bf16 %v1906_v10, %v1905_v9  ;;  %v3132_v19 = vunpack.i.h.bf16 %v3130_v13  ;;  %v3131_v45 = vunpack.i.l.bf16 %v3130_v13 }
  0xd6   : > { %3419 = vrot.lane.b32.xlu1 %v4182_v1, %s3779_s5  ;;  %v3127_v48 = vunpack.i.h.bf16 %v3125_v14  ;;  %v3126_v35 = vunpack.i.l.bf16 %v3125_v14 }
  0xd7   : > { %3414 = vrot.lane.b32.xlu0 %v4130_v4, %s3779_s5  ;;  %2879 = vmatmul.mubr.msk.bf16.vlgmr.msra.gmra.mrb[0].mxu0 %vm1978_vm12, %v1936_v16  ;;  %v1711_v62 = vsel %vm1704_vm5, %v1678_v58, %v3131_v45  ;;  %v1712_v63 = vsel %vm1704_vm5, %v1679_v37, %v3132_v19 }
  0xd8   : > { %v3140_v15 = vpop.permute.xlu1 %3139  ;;  %v1710_v56 = vsel %vm1704_vm5, %v1677_v60, %v3127_v48  ;;  %v1709_v57 = vsel %vm1704_vm5, %v1676_v61, %v3126_v35 }
  0xd9   : > { %v3135_v18 = vpop.permute.xlu0 %3134  ;;  %v3142_v51 = vunpack.i.h.bf16 %v3140_v15  ;;  %v3141_v52 = vunpack.i.l.bf16 %v3140_v15 }
  0xda   : > { %3429 = vrot.lane.b32.xlu1 %v4130_v4, %s3774_s10  ;;  %v3136_v59 = vunpack.i.l.bf16 %v3135_v18 }
  0xdb   : > { %3424 = vrot.lane.b32.xlu0 %v4136_v47, %s3780_s6  ;;  %v1744_v44 = vsel %vm1737_vm6, %v1711_v62, %v3141_v52  ;;  %v1745_v43 = vsel %vm1737_vm6, %v1712_v63, %v3142_v51 }
  0xdc   : > { %v4206_v21 = vpop.permute.xlu1 %3149 }
  0xdd   : > { %v4208_v22 = vpop.permute.xlu0 %3144  ;;  %v3152_v10 = vunpack.i.h.bf16 %v4206_v21  ;;  %v3151_v13 = vunpack.i.l.bf16 %v4206_v21 }
  0xde   : > { %3439 = vrot.lane.b32.xlu1 %v4182_v1, %s3774_s10  ;;  %v3147_v0 = vunpack.i.h.bf16 %v4208_v22  ;;  %v3146_v28 = vunpack.i.l.bf16 %v4208_v22 }
  0xdf   : > { %3434 = vrot.lane.b32.xlu0 %v4204_v20, %s3780_s6  ;;  %v1777_v42 = vsel %vm1770_vm7, %v1744_v44, %v3151_v13  ;;  %v1778_v19 = vsel %vm1770_vm7, %v1745_v43, %v3152_v10  ;;  %v545_v10 = vld [vmem:[#allocation2 + $0x152] sm:$0xff] }
  0xe0   : > { %v4214_v27 = vpop.permute.xlu1 %3159 }
  0xe1   : > { %v4216_v4 = vpop.permute.xlu0 %3154  ;;  %v3162_v41 = vunpack.i.h.bf16 %v4214_v27 }
  0xe2   : > { %3449 = vrot.lane.b32.xlu1 %v4204_v20, %s3773_s9  ;;  %v3157_v3 = vunpack.i.h.bf16 %v4216_v4  ;;  %v3156_v46 = vunpack.i.l.bf16 %v4216_v4 }
  0xe3   : > { %3444 = vrot.lane.b32.xlu0 %v4136_v47, %s3773_s9  ;;  %v3137_v47 = vunpack.i.h.bf16 %v3135_v18  ;;  %v3161_v18 = vunpack.i.l.bf16 %v4214_v27  ;;  %v606_v27 = vld [vmem:[#allocation2 + $0x139] sm:$0xff]  ;;  %v1811_v51 = vsel %vm1803_vm8, %v1778_v19, %v3162_v41  ;;  %v4342_v41 = vld [vmem:[#allocation2 + $0x170] sm:$0xff] }
  0xe4   : > { %v4228_v49 = vpop.permute.xlu1 %3169  ;;  %v4292_v37 = vpack.i.bf16 %v607_v34, %v606_v27 }
  0xe5   : > { %v3165_v53 = vpop.permute.xlu0 %3164  ;;  %v1743_v7 = vsel %vm1737_vm6, %v1710_v56, %v3137_v47  ;;  %v3172_v21 = vunpack.i.h.bf16 %v4228_v49  ;;  %v3171_v4 = vunpack.i.l.bf16 %v4228_v49  ;;  %v1810_v49 = vsel %vm1803_vm8, %v1777_v42, %v3161_v18 }
  0xe6   : > { %3459 = vrot.lane.b32.xlu1 %v4222_v36, %s3775_s11  ;;  %v3167_v8 = vunpack.i.h.bf16 %v3165_v53  ;;  %v3166_v9 = vunpack.i.l.bf16 %v3165_v53  ;;  %v1776_v17 = vsel %vm1770_vm7, %v1743_v7, %v3147_v0 }
  0xe7   : > { %3454 = vrot.lane.b32.xlu0 %v4138_v6, %s3775_s11  ;;  %v1742_v6 = vsel %vm1737_vm6, %v1709_v57, %v3136_v59  ;;  %v1809_v26 = vsel %vm1803_vm8, %v1776_v17, %v3157_v3  ;;  %v1844_v58 = vsel %vm1836_vm9, %v1811_v51, %v3172_v21  ;;  %v4340_v17 = vld [vmem:[#allocation2 + $0x168] sm:$0xff] }
  0xe8   : > { %v3180_v2 = vpop.permute.xlu1 %3179  ;;  %v1775_v15 = vsel %vm1770_vm7, %v1742_v6, %v3146_v28  ;;  %v1842_v31 = vsel %vm1836_vm9, %v1809_v26, %v3167_v8  ;;  %v4326_v6 = vld [vmem:[#allocation2 + $0x158] sm:$0xff] }
  0xe9   : > { %v3175_v5 = vpop.permute.xlu0 %3174  ;;  %v1808_v25 = vsel %vm1803_vm8, %v1775_v15, %v3156_v46  ;;  %v3182_v38 = vunpack.i.h.bf16 %v3180_v2  ;;  %v3181_v39 = vunpack.i.l.bf16 %v3180_v2  ;;  %v638_v2 = vld [vmem:[#allocation2 + $0x13a] sm:$0xff]  ;;  %v513_v8 = vld [vmem:[#allocation2 + $0x151] sm:$0xff] }
  0xea   : > { %3469 = vrot.lane.b32.xlu1 %v4230_v50, %s3776_s12  ;;  %v3177_v14 = vunpack.i.h.bf16 %v3175_v5  ;;  %v3176_v16 = vunpack.i.l.bf16 %v3175_v5  ;;  %v4324_v5 = vld [vmem:[#allocation2 + $0x150] sm:$0xff]  ;;  %v546_v15 = vld [vmem:[#allocation2 + $0x15a] sm:$0xff] }
  0xeb   : > { %3464 = vrot.lane.b32.xlu0 %v4182_v1, %s3776_s12  ;;  %v1841_v1 = vsel %vm1836_vm9, %v1808_v25, %v3166_v9  ;;  %v1877_v61 = vsel %vm1869_vm10, %v1844_v58, %v3182_v38  ;;  %v514_v9 = vld [vmem:[#allocation2 + $0x159] sm:$0xff]  ;;  %v4352_v34 = vpack.i.bf16 %v546_v15, %v545_v10  ;;  %v4356_v38 = vpack.i.bf16 %v4342_v41, %v4340_v17  ;;  %v611_v10 = vld [vmem:[#allocation2 + $0x171] sm:$0xff] }
  0xec   : > { %v4270_v22 = vpop.permute.xlu1 %3189  ;;  %v1874_v29 = vsel %vm1869_vm10, %v1841_v1, %v3176_v16  ;;  %v1875_v40 = vsel %vm1869_vm10, %v1842_v31, %v3177_v14  ;;  %v4338_v16 = vpack.i.bf16 %v4326_v6, %v4324_v5  ;;  %v4350_v31 = vpack.i.bf16 %v514_v9, %v513_v8 }
  0xed   : > { %v3185_v30 = vpop.permute.xlu0 %3184  ;;  %v3192_v18 = vunpack.i.h.bf16 %v4270_v22  ;;  %v3191_v25 = vunpack.i.l.bf16 %v4270_v22 }
  0xee   : > { %v3187_v32 = vunpack.i.h.bf16 %v3185_v30  ;;  %v3186_v33 = vunpack.i.l.bf16 %v3185_v30  ;;  %3479 = vrot.lane.b32.xlu1 %v4232_v54, %s3777_s13 }
  0xef   : > { %3474 = vrot.lane.b32.xlu0 %v4204_v20, %s3777_s13  ;;  %v1843_v20 = vsel %vm1836_vm9, %v1810_v49, %v3171_v4  ;;  %v1680_v42 = vsel %vm326_vm3, %v4009_v11, %v3191_v25 }
  0xf0   : > { %v1907_v45 = vsel %vm1902_vm11, %v1874_v29, %v3186_v33  ;;  %v1908_v48 = vsel %vm1902_vm11, %v1875_v40, %v3187_v32  ;;  %v4288_v35 = vpop.permute.xlu1 %3199  ;;  %v1876_v60 = vsel %vm1869_vm10, %v1843_v20, %v3181_v39  ;;  %v1681_v40 = vsel %vm326_vm3, %v4011_v12, %v3192_v18 }
  0xf1   : > { %v1937_v52 = vpack.c.bf16 %v1908_v48, %v1907_v45  ;;  %v3195_v53 = vpop.permute.xlu0 %3194  ;;  %v3202_v13 = vunpack.i.h.bf16 %v4288_v35  ;;  %v3201_v14 = vunpack.i.l.bf16 %v4288_v35 }
  0xf2   : > { %v3197_v47 = vunpack.i.h.bf16 %v3195_v53  ;;  %v3196_v59 = vunpack.i.l.bf16 %v3195_v53  ;;  %3489 = vrot.lane.b32.xlu1 %v4234_v55, %s3778_s22 }
  0xf3   : > { %3484 = vrot.lane.b32.xlu0 %v4222_v36, %s3778_s22  ;;  %2882 = vmatprep.mubr.msk.bf16.mxu0 %vm1978_vm12, %v1937_v52  ;;  %v639_v36 = vld [vmem:[#allocation2 + $0x142] sm:$0xff]  ;;  %v1683_v22 = vsel %vm326_vm3, %v4026_v24, %v3202_v13 }
  0xf4   : > { %v1910_v62 = vsel %vm1902_vm11, %v1877_v61, %v3197_v47  ;;  %v1909_v63 = vsel %vm1902_vm11, %v1876_v60, %v3196_v59  ;;  %v3210_v56 = vpop.permute.xlu1 %3209  ;;  %v4314_v43 = vpack.i.bf16 %v639_v36, %v638_v2 }
  0xf5   : > { %v1938_v57 = vpack.c.bf16 %v1910_v62, %v1909_v63  ;;  %v3205_v0 = vpop.permute.xlu0 %3204  ;;  %v3212_v26 = vunpack.i.h.bf16 %v3210_v56  ;;  %v3211_v21 = vunpack.i.l.bf16 %v3210_v56 }
  0xf6   : > { %3499 = vrot.lane.b32.xlu1 %v4292_v37, %s3779_s5  ;;  %v3207_v4 = vunpack.i.h.bf16 %v3205_v0  ;;  %v3206_v30 = vunpack.i.l.bf16 %v3205_v0 }
  0xf7   : > { %3494 = vrot.lane.b32.xlu0 %v4230_v50, %s3779_s5  ;;  %2883 = vmatmul.mubr.msk.bf16.gmra.mrb[4].mxu0 %vm1978_vm12, %v1938_v57  ;;  %v1716_v45 = vsel %vm1704_vm5, %v1683_v22, %v3212_v26 }
  0xf8   : > { %v3220_v28 = vpop.permute.xlu1 %3219  ;;  %v1713_v24 = vsel %vm1704_vm5, %v1680_v42, %v3206_v30 }
  0xf9   : > { %v3215_v44 = vpop.permute.xlu0 %3214  ;;  %v3222_v32 = vunpack.i.h.bf16 %v3220_v28  ;;  %v3221_v33 = vunpack.i.l.bf16 %v3220_v28 }
  0xfa   : > { %3509 = vrot.lane.b32.xlu1 %v4230_v50, %s3774_s10  ;;  %v3217_v39 = vunpack.i.h.bf16 %v3215_v44  ;;  %v3216_v29 = vunpack.i.l.bf16 %v3215_v44 }
  0xfb   : > { %3504 = vrot.lane.b32.xlu0 %v4232_v54, %s3780_s6  ;;  %v1749_v11 = vsel %vm1737_vm6, %v1716_v45, %v3222_v32 }
  0xfc   : > { %v4316_v3 = vpop.permute.xlu1 %3229 }
  0xfd   : > { %v4318_v46 = vpop.permute.xlu0 %3224  ;;  %v3232_v59 = vunpack.i.h.bf16 %v4316_v3  ;;  %v3231_v60 = vunpack.i.l.bf16 %v4316_v3 }
  0xfe   : > { %3519 = vrot.lane.b32.xlu1 %v4292_v37, %s3774_s10  ;;  %v3227_v48 = vunpack.i.h.bf16 %v4318_v46  ;;  %v3226_v35 = vunpack.i.l.bf16 %v4318_v46 }
  0xff   : > { %3514 = vrot.lane.b32.xlu0 %v4314_v43, %s3780_s6  ;;  %v1782_v26 = vsel %vm1770_vm7, %v1749_v11, %v3232_v59  ;;  %v549_v59 = vld [vmem:[#allocation2 + $0x182] sm:$0xff] }
 0x100   : > { %v4328_v50 = vpop.permute.xlu1 %3239 }
 0x101   : > { %v4330_v7 = vpop.permute.xlu0 %3234  ;;  %v3242_v57 = vunpack.i.h.bf16 %v4328_v50  ;;  %v3241_v0 = vunpack.i.l.bf16 %v4328_v50  ;;  %v610_v50 = vld [vmem:[#allocation2 + $0x169] sm:$0xff] }
 0x102   : > { %3529 = vrot.lane.b32.xlu1 %v4314_v43, %s3773_s9  ;;  %v3237_v51 = vunpack.i.h.bf16 %v4330_v7  ;;  %v3236_v52 = vunpack.i.l.bf16 %v4330_v7  ;;  %v4414_v22 = vpack.i.bf16 %v611_v10, %v610_v50 }
 0x103   : > { %3524 = vrot.lane.b32.xlu0 %v4232_v54, %s3773_s9  ;;  %v1682_v54 = vsel %vm326_vm3, %v4024_v23, %v3201_v14  ;;  %v1714_v23 = vsel %vm1704_vm5, %v1681_v40, %v3207_v4  ;;  %v1815_v32 = vsel %vm1803_vm8, %v1782_v26, %v3242_v57  ;;  %v4460_v57 = vld [vmem:[#allocation2 + $0x1a0] sm:$0xff] }
 0x104   : > { %v4348_v1 = vpop.permute.xlu1 %3249  ;;  %v1715_v19 = vsel %vm1704_vm5, %v1682_v54, %v3211_v21  ;;  %v1747_v20 = vsel %vm1737_vm6, %v1714_v23, %v3217_v39 }
 0x105   : > { %v3245_v27 = vpop.permute.xlu0 %3244  ;;  %v1748_v12 = vsel %vm1737_vm6, %v1715_v19, %v3221_v33  ;;  %v1780_v56 = vsel %vm1770_vm7, %v1747_v20, %v3227_v48  ;;  %v3252_v44 = vunpack.i.h.bf16 %v4348_v1  ;;  %v3251_v3 = vunpack.i.l.bf16 %v4348_v1 }
 0x106   : > { %3539 = vrot.lane.b32.xlu1 %v4338_v16, %s3775_s11  ;;  %v3247_v58 = vunpack.i.h.bf16 %v3245_v27  ;;  %v3246_v47 = vunpack.i.l.bf16 %v3245_v27  ;;  %v1813_v36 = vsel %vm1803_vm8, %v1780_v56, %v3237_v51  ;;  %v1781_v25 = vsel %vm1770_vm7, %v1748_v12, %v3231_v60  ;;  %v4458_v56 = vld [vmem:[#allocation2 + $0x198] sm:$0xff] }
 0x107   : > { %3534 = vrot.lane.b32.xlu0 %v4234_v55, %s3775_s11  ;;  %v1746_v55 = vsel %vm1737_vm6, %v1713_v24, %v3216_v29  ;;  %v1814_v1 = vsel %vm1803_vm8, %v1781_v25, %v3241_v0  ;;  %v1848_v54 = vsel %vm1836_vm9, %v1815_v32, %v3252_v44  ;;  %v374_v44 = vld [vmem:[#allocation2 + $0xb0] sm:$0xff] }
 0x108   : > { %v3260_v49 = vpop.permute.xlu1 %3259  ;;  %v1779_v63 = vsel %vm1770_vm7, %v1746_v55, %v3226_v35  ;;  %v1846_v7 = vsel %vm1836_vm9, %v1813_v36, %v3247_v58  ;;  %v486_v55 = vld [vmem:[#allocation2 + $0x188] sm:$0xff] }
 0x109   : > { %v3255_v53 = vpop.permute.xlu0 %3254  ;;  %v1812_v2 = vsel %vm1803_vm8, %v1779_v63, %v3236_v52  ;;  %v3262_v13 = vunpack.i.h.bf16 %v3260_v49  ;;  %v3261_v14 = vunpack.i.l.bf16 %v3260_v49  ;;  %v642_v49 = vld [vmem:[#allocation2 + $0x16a] sm:$0xff]  ;;  %v517_v58 = vld [vmem:[#allocation2 + $0x181] sm:$0xff] }
 0x10a   : > { %3549 = vrot.lane.b32.xlu1 %v4350_v31, %s3776_s12  ;;  %v3257_v61 = vunpack.i.h.bf16 %v3255_v53  ;;  %v3256_v62 = vunpack.i.l.bf16 %v3255_v53  ;;  %v485_v53 = vld [vmem:[#allocation2 + $0x180] sm:$0xff]  ;;  %v550_v63 = vld [vmem:[#allocation2 + $0x18a] sm:$0xff] }
 0x10b   : > { %3544 = vrot.lane.b32.xlu0 %v4292_v37, %s3776_s12  ;;  %v1845_v37 = vsel %vm1836_vm9, %v1812_v2, %v3246_v47  ;;  %v1881_v42 = vsel %vm1869_vm10, %v1848_v54, %v3262_v13  ;;  %v518_v47 = vld [vmem:[#allocation2 + $0x189] sm:$0xff] }
 0x10c   : > { %v4392_v28 = vpop.permute.xlu1 %3269  ;;  %v1878_v15 = vsel %vm1869_vm10, %v1845_v37, %v3256_v62  ;;  %v1879_v18 = vsel %vm1869_vm10, %v1846_v7, %v3257_v61  ;;  %v4456_v62 = vpack.i.bf16 %v486_v55, %v485_v53  ;;  %v373_v36 = vld [vmem:[#allocation2 + $0xa8] sm:$0xff]  ;;  %v371_v37 = vld [vmem:[#allocation2 + $0x90] sm:$0xff]  ;;  %v372_v7 = vld [vmem:[#allocation2 + $0x98] sm:$0xff]  ;;  %v4468_v10 = vpack.i.bf16 %v518_v47, %v517_v58 }
 0x10d   : > { %v3265_v46 = vpop.permute.xlu0 %3264  ;;  %v3272_v0 = vunpack.i.h.bf16 %v4392_v28  ;;  %v3271_v2 = vunpack.i.l.bf16 %v4392_v28  ;;  %v3648_v28 = vpack.i.bf16 %v4460_v57, %v4458_v56 }
 0x10e   : > { %v3267_v8 = vunpack.i.h.bf16 %v3265_v46  ;;  %v3266_v9 = vunpack.i.l.bf16 %v3265_v46  ;;  %3559 = vrot.lane.b32.xlu1 %v4352_v34, %s3777_s13 }
 0x10f   : > { %3554 = vrot.lane.b32.xlu0 %v4314_v43, %s3777_s13  ;;  %v1847_v43 = vsel %vm1836_vm9, %v1814_v1, %v3251_v3 }
 0x110   : > { %v1911_v21 = vsel %vm1902_vm11, %v1878_v15, %v3266_v9  ;;  %v1912_v4 = vsel %vm1902_vm11, %v1879_v18, %v3267_v8  ;;  %v4410_v30 = vpop.permute.xlu1 %3279  ;;  %v1880_v40 = vsel %vm1869_vm10, %v1847_v43, %v3261_v14  ;;  %v4470_v18 = vpack.i.bf16 %v550_v63, %v549_v59 }
 0x111   : > { %v1939_v33 = vpack.c.bf16 %v1912_v4, %v1911_v21  ;;  %v3275_v27 = vpop.permute.xlu0 %3274  ;;  %v3282_v60 = vunpack.i.h.bf16 %v4410_v30  ;;  %v3281_v61 = vunpack.i.l.bf16 %v4410_v30  ;;  %v1685_v4 = vsel %vm326_vm3, %v372_v7, %v3272_v0 }
 0x112   : > { %v3277_v39 = vunpack.i.h.bf16 %v3275_v27  ;;  %v3276_v29 = vunpack.i.l.bf16 %v3275_v27  ;;  %3569 = vrot.lane.b32.xlu1 %v4356_v38, %s3778_s22  ;;  %v1684_v30 = vsel %vm326_vm3, %v371_v37, %v3271_v2 }
 0x113   : > { %3564 = vrot.lane.b32.xlu0 %v4338_v16, %s3778_s22  ;;  %2886 = vmatprep.mubr.msk.bf16.mxu0 %vm1978_vm12, %v1939_v33  ;;  %v643_v16 = vld [vmem:[#allocation2 + $0x172] sm:$0xff]  ;;  %v1687_v25 = vsel %vm326_vm3, %v374_v44, %v3282_v60 }
 0x114   : > { %v1914_v19 = vsel %vm1902_vm11, %v1881_v42, %v3277_v39  ;;  %v1913_v45 = vsel %vm1902_vm11, %v1880_v40, %v3276_v29  ;;  %v3290_v23 = vpop.permute.xlu1 %3289  ;;  %v4438_v11 = vpack.i.bf16 %v643_v16, %v642_v49 }
 0x115   : > { %v1940_v24 = vpack.c.bf16 %v1914_v19, %v1913_v45  ;;  %v3285_v48 = vpop.permute.xlu0 %3284  ;;  %v3292_v3 = vunpack.i.h.bf16 %v3290_v23  ;;  %v3291_v46 = vunpack.i.l.bf16 %v3290_v23 }
 0x116   : > { %3579 = vrot.lane.b32.xlu1 %v4414_v22, %s3779_s5  ;;  %v3287_v8 = vunpack.i.h.bf16 %v3285_v48  ;;  %v3286_v9 = vunpack.i.l.bf16 %v3285_v48 }
 0x117   : > { %3574 = vrot.lane.b32.xlu0 %v4350_v31, %s3779_s5  ;;  %2887 = vmatmul.mubr.msk.bf16.gmra.mrb[8].mxu0 %vm1978_vm12, %v1940_v24  ;;  %v1720_v32 = vsel %vm1704_vm5, %v1687_v25, %v3292_v3 }
 0x118   : > { %v3300_v35 = vpop.permute.xlu1 %3299  ;;  %v1718_v33 = vsel %vm1704_vm5, %v1685_v4, %v3287_v8  ;;  %v1717_v27 = vsel %vm1704_vm5, %v1684_v30, %v3286_v9 }
 0x119   : > { %v4432_v12 = vpop.permute.xlu0 %3294  ;;  %v3302_v13 = vunpack.i.h.bf16 %v3300_v35  ;;  %v3301_v14 = vunpack.i.l.bf16 %v3300_v35 }
 0x11a   : > { %3589 = vrot.lane.b32.xlu1 %v4350_v31, %s3774_s10  ;;  %v3297_v26 = vunpack.i.h.bf16 %v4432_v12  ;;  %v3296_v21 = vunpack.i.l.bf16 %v4432_v12 }
 0x11b   : > { %3584 = vrot.lane.b32.xlu0 %v4352_v34, %s3780_s6  ;;  %v1753_v40 = vsel %vm1737_vm6, %v1720_v32, %v3302_v13 }
 0x11c   : > { %v4440_v51 = vpop.permute.xlu1 %3309  ;;  %v1751_v23 = vsel %vm1737_vm6, %v1718_v33, %v3297_v26  ;;  %v646_v33 = vld [vmem:[#allocation2 + $0x19a] sm:$0xff] }
 0x11d   : > { %v4442_v52 = vpop.permute.xlu0 %3304  ;;  %v3312_v35 = vunpack.i.h.bf16 %v4440_v51  ;;  %v3311_v49 = vunpack.i.l.bf16 %v4440_v51 }
 0x11e   : > { %3599 = vrot.lane.b32.xlu1 %v4414_v22, %s3774_s10  ;;  %v3307_v43 = vunpack.i.h.bf16 %v4442_v52  ;;  %v3306_v54 = vunpack.i.l.bf16 %v4442_v52 }
 0x11f   : > { %3594 = vrot.lane.b32.xlu0 %v4438_v11, %s3780_s6  ;;  %v1786_v8 = vsel %vm1770_vm7, %v1753_v40, %v3312_v35  ;;  %v378_v35 = vld [vmem:[#allocation2 + $0xe0] sm:$0xff] }
 0x120   : > { %v4448_v20 = vpop.permute.xlu1 %3319  ;;  %v1784_v53 = vsel %vm1770_vm7, %v1751_v23, %v3307_v43 }
 0x121   : > { %v4450_v31 = vpop.permute.xlu0 %3314  ;;  %v3322_v55 = vunpack.i.h.bf16 %v4448_v20 }
 0x122   : > { %3609 = vrot.lane.b32.xlu1 %v4438_v11, %s3773_s9  ;;  %v3317_v42 = vunpack.i.h.bf16 %v4450_v31  ;;  %v3316_v19 = vunpack.i.l.bf16 %v4450_v31  ;;  %v3321_v31 = vunpack.i.l.bf16 %v4448_v20  ;;  %v614_v20 = vld [vmem:[#allocation2 + $0x199] sm:$0xff] }
 0x123   : > { %3604 = vrot.lane.b32.xlu0 %v4352_v34, %s3773_s9  ;;  %v1686_v34 = vsel %vm326_vm3, %v373_v36, %v3281_v61  ;;  %v615_v36 = vld [vmem:[#allocation2 + $0x1a1] sm:$0xff] }
 0x124   : > { %v4466_v50 = vpop.permute.xlu1 %3329  ;;  %v1719_v1 = vsel %vm1704_vm5, %v1686_v34, %v3291_v46  ;;  %v1817_v59 = vsel %vm1803_vm8, %v1784_v53, %v3317_v42  ;;  %v3658_v26 = vpack.i.bf16 %v615_v36, %v614_v20 }
 0x125   : > { %v3325_v15 = vpop.permute.xlu0 %3324  ;;  %v1752_v29 = vsel %vm1737_vm6, %v1719_v1, %v3301_v14  ;;  %v3332_v51 = vunpack.i.h.bf16 %v4466_v50  ;;  %v3331_v60 = vunpack.i.l.bf16 %v4466_v50 }
 0x126   : > { %3619 = vrot.lane.b32.xlu1 %v4456_v62, %s3775_s11  ;;  %v3327_v24 = vunpack.i.h.bf16 %v3325_v15  ;;  %v3326_v48 = vunpack.i.l.bf16 %v3325_v15  ;;  %v1785_v7 = vsel %vm1770_vm7, %v1752_v29, %v3311_v49  ;;  %v1819_v15 = vsel %vm1803_vm8, %v1786_v8, %v3322_v55 }
 0x127   : > { %3614 = vrot.lane.b32.xlu0 %v4356_v38, %s3775_s11  ;;  %v1750_v38 = vsel %vm1737_vm6, %v1717_v27, %v3296_v21  ;;  %v1818_v14 = vsel %vm1803_vm8, %v1785_v7, %v3321_v31  ;;  %v647_v27 = vld [vmem:[#allocation2 + $0x1a2] sm:$0xff]  ;;  %s2678_s11 = sshll.u32 %s3832_s19, 11 }
 0x128   : > { %v3340_v39 = vpop.permute.xlu1 %3339  ;;  %v1783_v52 = vsel %vm1770_vm7, %v1750_v38, %v3306_v54  ;;  %v1850_v63 = vsel %vm1836_vm9, %v1817_v59, %v3327_v24  ;;  %v1851_v21 = vsel %vm1836_vm9, %v1818_v14, %v3331_v60  ;;  %v3668_v56 = vpack.i.bf16 %v647_v27, %v646_v33  ;;  %s4779_s14 = scalar_lea.hbm %s4853_s3, %s2678_s11 }
 0x129   : > { %v3335_v45 = vpop.permute.xlu0 %3334  ;;  %v1816_v47 = vsel %vm1803_vm8, %v1783_v52, %v3316_v19  ;;  %v3342_v44 = vunpack.i.h.bf16 %v3340_v39  ;;  %v3341_v3 = vunpack.i.l.bf16 %v3340_v39  ;;  %v376_v52 = vld [vmem:[#allocation2 + $0xc8] sm:$0xff] }
 0x12a   : > { %3629 = vrot.lane.b32.xlu1 %v4468_v10, %s3776_s12  ;;  %v3337_v16 = vunpack.i.h.bf16 %v3335_v45  ;;  %v3336_v12 = vunpack.i.l.bf16 %v3335_v45 }
 0x12b   : > { %3624 = vrot.lane.b32.xlu0 %v4414_v22, %s3776_s12  ;;  %v1849_v22 = vsel %vm1836_vm9, %v1816_v47, %v3326_v48  ;;  %v1884_v1 = vsel %vm1869_vm10, %v1851_v21, %v3341_v3  ;;  %v377_v48 = vld [vmem:[#allocation2 + $0xd8] sm:$0xff] }
 0x12c   : > { %v4506_v58 = vpop.permute.xlu1 %3349  ;;  %v1882_v46 = vsel %vm1869_vm10, %v1849_v22, %v3336_v12  ;;  %v1883_v37 = vsel %vm1869_vm10, %v1850_v63, %v3337_v16  ;;  %v375_v12 = vld [vmem:[#allocation2 + $0xc0] sm:$0xff] }
 0x12d   : > { %v3345_v61 = vpop.permute.xlu0 %3344  ;;  %v3352_v24 = vunpack.i.h.bf16 %v4506_v58 }
 0x12e   : > { %v3347_v0 = vunpack.i.h.bf16 %v3345_v61  ;;  %v3346_v2 = vunpack.i.l.bf16 %v3345_v61  ;;  %3639 = vrot.lane.b32.xlu1 %v4470_v18, %s3777_s13 }
 0x12f   : > { %3634 = vrot.lane.b32.xlu0 %v4438_v11, %s3777_s13  ;;  %v1852_v11 = vsel %vm1836_vm9, %v1819_v15, %v3332_v51 }
 0x130   : > { %v1915_v9 = vsel %vm1902_vm11, %v1882_v46, %v3346_v2  ;;  %v1916_v50 = vsel %vm1902_vm11, %v1883_v37, %v3347_v0  ;;  %v3360_v13 = vpop.permute.xlu1 %3359  ;;  %v1885_v32 = vsel %vm1869_vm10, %v1852_v11, %v3342_v44 }
 0x131   : > { %v1941_v25 = vpack.c.bf16 %v1916_v50, %v1915_v9  ;;  %v3355_v34 = vpop.permute.xlu0 %3354  ;;  %v3362_v38 = vunpack.i.h.bf16 %v3360_v13  ;;  %v3361_v23 = vunpack.i.l.bf16 %v3360_v13 }
 0x132   : > { %v3357_v4 = vunpack.i.h.bf16 %v3355_v34  ;;  %v3356_v30 = vunpack.i.l.bf16 %v3355_v34  ;;  %3649 = vrot.lane.b32.xlu1 %v3648_v28, %s3778_s22 }
 0x133   : > { %3644 = vrot.lane.b32.xlu0 %v4456_v62, %s3778_s22  ;;  %2890 = vmatprep.mubr.msk.bf16.mxu0 %vm1978_vm12, %v1941_v25  ;;  %v1691_v51 = vsel %vm326_vm3, %v378_v35, %v3362_v38  ;;  %v1690_v60 = vsel %vm326_vm3, %v377_v48, %v3361_v23  ;;  %s4786_s22 = scalar_lea.sflag [#allocation4], %s185_s27 }
 0x134   : > { %v1918_v43 = vsel %vm1902_vm11, %v1885_v32, %v3357_v4  ;;  %v1917_v54 = vsel %vm1902_vm11, %v1884_v1, %v3356_v30  ;;  %v3370_v39 = vpop.permute.xlu1 %3369 }
 0x135   : > { %v1942_v29 = vpack.c.bf16 %v1918_v43, %v1917_v54  ;;  %v3365_v40 = vpop.permute.xlu0 %3364  ;;  %v3372_v49 = vunpack.i.h.bf16 %v3370_v39  ;;  %v3371_v16 = vunpack.i.l.bf16 %v3370_v39 }
 0x136   : > { %3659 = vrot.lane.b32.xlu1 %v3658_v26, %s3779_s5  ;;  %v3367_v53 = vunpack.i.h.bf16 %v3365_v40 }
 0x137   : > { %3654 = vrot.lane.b32.xlu0 %v4468_v10, %s3779_s5  ;;  %2891 = vmatmul.mubr.msk.bf16.gmra.mrb[12].mxu0 %vm1978_vm12, %v1942_v29  ;;  %v3351_v10 = vunpack.i.l.bf16 %v4506_v58  ;;  %v1689_v58 = vsel %vm326_vm3, %v376_v52, %v3352_v24  ;;  %v1723_v0 = vsel %vm1704_vm5, %v1690_v60, %v3371_v16  ;;  %v1724_v2 = vsel %vm1704_vm5, %v1691_v51, %v3372_v49 }
 0x138   : > { %v3380_v62 = vpop.permute.xlu1 %3379  ;;  %v1722_v20 = vsel %vm1704_vm5, %v1689_v58, %v3367_v53 }
 0x139   : > { %v3375_v57 = vpop.permute.xlu0 %3374  ;;  %v3382_v31 = vunpack.i.h.bf16 %v3380_v62  ;;  %v3381_v47 = vunpack.i.l.bf16 %v3380_v62  ;;  %v1688_v63 = vsel %vm326_vm3, %v375_v12, %v3351_v10 }
 0x13a   : > { %3669 = vrot.lane.b32.xlu1 %v3668_v56, %s3780_s6  ;;  %v3377_v61 = vunpack.i.h.bf16 %v3375_v57  ;;  %v3376_v22 = vunpack.i.l.bf16 %v3375_v57 }
 0x13b   : > { %3664 = vrot.lane.b32.xlu0 %v4470_v18, %s3780_s6  ;;  %v3366_v18 = vunpack.i.l.bf16 %v3365_v40  ;;  %v1756_v37 = vsel %vm1737_vm6, %v1723_v0, %v3381_v47  ;;  %v1757_v7 = vsel %vm1737_vm6, %v1724_v2, %v3382_v31 }
 0x13c   : > { %v4546_v28 = vpop.permute.xlu1 %3389  ;;  %v1755_v14 = vsel %vm1737_vm6, %v1722_v20, %v3377_v61 }
 0x13d   : > { %v3385_v42 = vpop.permute.xlu0 %3384  ;;  %v1721_v36 = vsel %vm1704_vm5, %v1688_v63, %v3366_v18  ;;  %v3392_v34 = vunpack.i.h.bf16 %v4546_v28  ;;  %v3391_v26 = vunpack.i.l.bf16 %v4546_v28 }
 0x13e   : > { %v3387_v44 = vunpack.i.h.bf16 %v3385_v42  ;;  %v3386_v3 = vunpack.i.l.bf16 %v3385_v42  ;;  %v1754_v13 = vsel %vm1737_vm6, %v1721_v36, %v3376_v22 }
 0x13f   : > { %v1789_v38 = vsel %vm1770_vm7, %v1756_v37, %v3391_v26  ;;  %v1790_v23 = vsel %vm1770_vm7, %v1757_v7, %v3392_v34  ;;  %v381_v7 = vld [vmem:[#allocation2 + $0x108] sm:$0xff] }
 0x140   : > { %v4548_v19 = vpop.permute.xlu1 %3399  ;;  %v1787_v4 = vsel %vm1770_vm7, %v1754_v13, %v3386_v3  ;;  %v1788_v30 = vsel %vm1770_vm7, %v1755_v14, %v3387_v44  ;;  %v379_v13 = vld [vmem:[#allocation2 + $0xf0] sm:$0xff]  ;;  %v380_v14 = vld [vmem:[#allocation2 + $0xf8] sm:$0xff] }
 0x141   : > { %v3395_v45 = vpop.permute.xlu0 %3394  ;;  %v3402_v1 = vunpack.i.h.bf16 %v4548_v19  ;;  %v3401_v32 = vunpack.i.l.bf16 %v4548_v19 }
 0x142   : > { %v3397_v8 = vunpack.i.h.bf16 %v3395_v45  ;;  %v3396_v9 = vunpack.i.l.bf16 %v3395_v45 }
 0x143   : > { %v1822_v35 = vsel %vm1803_vm8, %v1789_v38, %v3401_v32  ;;  %v1823_v49 = vsel %vm1803_vm8, %v1790_v23, %v3402_v1 }
 0x144   : > { %v3410_v55 = vpop.permute.xlu1 %3409  ;;  %v1820_v27 = vsel %vm1803_vm8, %v1787_v4, %v3396_v9  ;;  %v1821_v43 = vsel %vm1803_vm8, %v1788_v30, %v3397_v8  ;;  %v382_v8 = vld [vmem:[#allocation2 + $0x110] sm:$0xff] }
 0x145   : > { %v3405_v59 = vpop.permute.xlu0 %3404  ;;  %v3412_v54 = vunpack.i.h.bf16 %v3410_v55  ;;  %v3411_v39 = vunpack.i.l.bf16 %v3410_v55 }
 0x146   : > { %v3407_v15 = vunpack.i.h.bf16 %v3405_v59  ;;  %v3406_v25 = vunpack.i.l.bf16 %v3405_v59 }
 0x147   : > { %v1855_v52 = vsel %vm1836_vm9, %v1822_v35, %v3411_v39  ;;  %v1856_v53 = vsel %vm1836_vm9, %v1823_v49, %v3412_v54 }
 0x148   : > { %v3420_v46 = vpop.permute.xlu1 %3419  ;;  %v1853_v40 = vsel %vm1836_vm9, %v1820_v27, %v3406_v25  ;;  %v1854_v56 = vsel %vm1836_vm9, %v1821_v43, %v3407_v15 }
 0x149   : > { %v3415_v50 = vpop.permute.xlu0 %3414  ;;  %v3422_v28 = vunpack.i.h.bf16 %v3420_v46  ;;  %v3421_v42 = vunpack.i.l.bf16 %v3420_v46 }
 0x14a   : > { %v3417_v21 = vunpack.i.h.bf16 %v3415_v50  ;;  %v3416_v11 = vunpack.i.l.bf16 %v3415_v50 }
 0x14b   : > { %v1888_v31 = vsel %vm1869_vm10, %v1855_v52, %v3421_v42  ;;  %v1889_v47 = vsel %vm1869_vm10, %v1856_v53, %v3422_v28 }
 0x14c   : > { %v4570_v33 = vpop.permute.xlu1 %3429  ;;  %v1886_v45 = vsel %vm1869_vm10, %v1853_v40, %v3416_v11  ;;  %v1887_v19 = vsel %vm1869_vm10, %v1854_v56, %v3417_v21 }
 0x14d   : > { %v3425_v29 = vpop.permute.xlu0 %3424  ;;  %v3432_v46 = vunpack.i.h.bf16 %v4570_v33  ;;  %v3431_v37 = vunpack.i.l.bf16 %v4570_v33 }
 0x14e   : > { %v3427_v62 = vunpack.i.h.bf16 %v3425_v29  ;;  %v3426_v57 = vunpack.i.l.bf16 %v3425_v29 }
 0x14f   : > { %v1693_v33 = vsel %vm326_vm3, %v380_v14, %v3432_v46  ;;  %v1692_v27 = vsel %vm326_vm3, %v379_v13, %v3431_v37 }
 0x150   : > { %v1919_v24 = vsel %vm1902_vm11, %v1886_v45, %v3426_v57  ;;  %v1920_v10 = vsel %vm1902_vm11, %v1887_v19, %v3427_v62  ;;  %v3440_v48 = vpop.permute.xlu1 %3439 }
 0x151   : > { %v1943_v16 = vpack.c.bf16 %v1920_v10, %v1919_v24  ;;  %v3435_v12 = vpop.permute.xlu0 %3434  ;;  %v3442_v44 = vunpack.i.h.bf16 %v3440_v48  ;;  %v3441_v3 = vunpack.i.l.bf16 %v3440_v48 }
 0x152   : > { %v3437_v18 = vunpack.i.h.bf16 %v3435_v12  ;;  %v3436_v55 = vunpack.i.l.bf16 %v3435_v12 }
 0x153   : > { %2894 = vmatprep.mubr.msk.bf16.mxu0 %vm1978_vm12, %v1943_v16  ;;  %v1695_v4 = vsel %vm326_vm3, %v382_v8, %v3442_v44  ;;  %v1694_v30 = vsel %vm326_vm3, %v381_v7, %v3441_v3 }
 0x154   : > { %v1922_v59 = vsel %vm1902_vm11, %v1889_v47, %v3437_v18  ;;  %v1921_v51 = vsel %vm1902_vm11, %v1888_v31, %v3436_v55  ;;  %v3450_v60 = vpop.permute.xlu1 %3449 }
 0x155   : > { %v1944_v61 = vpack.c.bf16 %v1922_v59, %v1921_v51  ;;  %v3445_v22 = vpop.permute.xlu0 %3444  ;;  %v3452_v9 = vunpack.i.h.bf16 %v3450_v60  ;;  %v3451_v50 = vunpack.i.l.bf16 %v3450_v60 }
 0x156   : > { %v3447_v15 = vunpack.i.h.bf16 %v3445_v22  ;;  %v3446_v25 = vunpack.i.l.bf16 %v3445_v22 }
 0x157   : > { %2895 = vmatmul.mubr.msk.bf16.gmra.mrb[16].mxu0 %vm1978_vm12, %v1944_v61  ;;  %v1727_v43 = vsel %vm1704_vm5, %v1694_v30, %v3451_v50  ;;  %v1728_v54 = vsel %vm1704_vm5, %v1695_v4, %v3452_v9 }
 0x158   : > { %v3460_v58 = vpop.permute.xlu1 %3459  ;;  %v1726_v39 = vsel %vm1704_vm5, %v1693_v33, %v3447_v15  ;;  %v1725_v29 = vsel %vm1704_vm5, %v1692_v27, %v3446_v25 }
 0x159   : > { %v3455_v63 = vpop.permute.xlu0 %3454  ;;  %v3462_v26 = vunpack.i.h.bf16 %v3460_v58  ;;  %v3461_v21 = vunpack.i.l.bf16 %v3460_v58 }
 0x15a   : > { %v3457_v1 = vunpack.i.h.bf16 %v3455_v63  ;;  %v3456_v32 = vunpack.i.l.bf16 %v3455_v63 }
 0x15b   : > { %v1760_v57 = vsel %vm1737_vm6, %v1727_v43, %v3461_v21  ;;  %v1761_v28 = vsel %vm1737_vm6, %v1728_v54, %v3462_v26 }
 0x15c   : > { %v4592_v0 = vpop.permute.xlu1 %3469  ;;  %v1758_v38 = vsel %vm1737_vm6, %v1725_v29, %v3456_v32  ;;  %v1759_v23 = vsel %vm1737_vm6, %v1726_v39, %v3457_v1 }
 0x15d   : > { %v3465_v2 = vpop.permute.xlu0 %3464  ;;  %v3472_v48 = vunpack.i.h.bf16 %v4592_v0  ;;  %v3471_v35 = vunpack.i.l.bf16 %v4592_v0 }
 0x15e   : > { %v3467_v40 = vunpack.i.h.bf16 %v3465_v2  ;;  %v3466_v56 = vunpack.i.l.bf16 %v3465_v2 }
 0x15f   : > { %v1793_v44 = vsel %vm1770_vm7, %v1760_v57, %v3471_v35  ;;  %v1794_v3 = vsel %vm1770_vm7, %v1761_v28, %v3472_v48 }
 0x160   : > { %v4594_v20 = vpop.permute.xlu1 %3479  ;;  %v1791_v12 = vsel %vm1770_vm7, %v1758_v38, %v3466_v56  ;;  %v1792_v52 = vsel %vm1770_vm7, %v1759_v23, %v3467_v40 }
 0x161   : > { %v3475_v36 = vpop.permute.xlu0 %3474  ;;  %v3482_v53 = vunpack.i.h.bf16 %v4594_v20  ;;  %v3481_v18 = vunpack.i.l.bf16 %v4594_v20 }
 0x162   : > { %v3477_v42 = vunpack.i.h.bf16 %v3475_v36  ;;  %v3476_v45 = vunpack.i.l.bf16 %v3475_v36 }
 0x163   : > { %v1826_v8 = vsel %vm1803_vm8, %v1793_v44, %v3481_v18  ;;  %v1827_v9 = vsel %vm1803_vm8, %v1794_v3, %v3482_v53 }
 0x164   : > { %v3490_v34 = vpop.permute.xlu1 %3489  ;;  %v1824_v31 = vsel %vm1803_vm8, %v1791_v12, %v3476_v45  ;;  %v1825_v47 = vsel %vm1803_vm8, %v1792_v52, %v3477_v42  ;;  %v383_v45 = vld [vmem:[#allocation2 + $0x120] sm:$0xff]  ;;  %v3677_v12 = vld [vmem:[#allocation2 + $0x138] sm:$0xff] }
 0x165   : > { %v3485_v11 = vpop.permute.xlu0 %3484  ;;  %v3492_v59 = vunpack.i.h.bf16 %v3490_v34  ;;  %v3491_v51 = vunpack.i.l.bf16 %v3490_v34 }
 0x166   : > { %v3487_v24 = vunpack.i.h.bf16 %v3485_v11  ;;  %v3486_v10 = vunpack.i.l.bf16 %v3485_v11 }
 0x167   : > { %v1859_v14 = vsel %vm1836_vm9, %v1826_v8, %v3491_v51  ;;  %v1860_v15 = vsel %vm1836_vm9, %v1827_v9, %v3492_v59 }
 0x168   : > { %v3500_v62 = vpop.permute.xlu1 %3499  ;;  %v1857_v61 = vsel %vm1836_vm9, %v1824_v31, %v3486_v10  ;;  %v1858_v22 = vsel %vm1836_vm9, %v1825_v47, %v3487_v24 }
 0x169   : > { %v3495_v19 = vpop.permute.xlu0 %3494  ;;  %v3502_v0 = vunpack.i.h.bf16 %v3500_v62  ;;  %v3501_v2 = vunpack.i.l.bf16 %v3500_v62 }
 0x16a   : > { %v3497_v49 = vunpack.i.h.bf16 %v3495_v19  ;;  %v3496_v16 = vunpack.i.l.bf16 %v3495_v19  ;;  %v384_v19 = vld [vmem:[#allocation2 + $0x128] sm:$0xff] }
 0x16b   : > { %v1892_v26 = vsel %vm1869_vm10, %v1859_v14, %v3501_v2  ;;  %v1893_v21 = vsel %vm1869_vm10, %v1860_v15, %v3502_v0 }
 0x16c   : > { %v4616_v55 = vpop.permute.xlu1 %3509  ;;  %v1890_v36 = vsel %vm1869_vm10, %v1857_v61, %v3496_v16  ;;  %v1891_v20 = vsel %vm1869_vm10, %v1858_v22, %v3497_v49  ;;  %v3676_v49 = vld [vmem:[#allocation2 + $0x140] sm:$0xff] }
 0x16d   : > { %v3505_v60 = vpop.permute.xlu0 %3504  ;;  %v3512_v62 = vunpack.i.h.bf16 %v4616_v55  ;;  %v3511_v57 = vunpack.i.l.bf16 %v4616_v55 }
 0x16e   : > { %v3507_v58 = vunpack.i.h.bf16 %v3505_v60  ;;  %v3506_v63 = vunpack.i.l.bf16 %v3505_v60 }
 0x16f   : > { %v1697_v55 = vsel %vm326_vm3, %v384_v19, %v3512_v62  ;;  %v1696_v31 = vsel %vm326_vm3, %v383_v45, %v3511_v57 }
 0x170   : > { %v1923_v46 = vsel %vm1902_vm11, %v1890_v36, %v3506_v63  ;;  %v1924_v37 = vsel %vm1902_vm11, %v1891_v20, %v3507_v58  ;;  %v3520_v7 = vpop.permute.xlu1 %3519 }
 0x171   : > { %v1945_v50 = vpack.c.bf16 %v1924_v37, %v1923_v46  ;;  %v3515_v13 = vpop.permute.xlu0 %3514  ;;  %v3522_v40 = vunpack.i.h.bf16 %v3520_v7  ;;  %v3521_v56 = vunpack.i.l.bf16 %v3520_v7 }
 0x172   : > { %v3517_v25 = vunpack.i.h.bf16 %v3515_v13  ;;  %v3516_v34 = vunpack.i.l.bf16 %v3515_v13 }
 0x173   : > { %2898 = vmatprep.mubr.msk.bf16.mxu0 %vm1978_vm12, %v1945_v50  ;;  %v1699_v16 = vsel %vm326_vm3, %v3676_v49, %v3522_v40  ;;  %v1698_v52 = vsel %vm326_vm3, %v3677_v12, %v3521_v56 }
 0x174   : > { %v1926_v11 = vsel %vm1902_vm11, %v1893_v21, %v3517_v25  ;;  %v1925_v4 = vsel %vm1902_vm11, %v1892_v26, %v3516_v34  ;;  %v3530_v30 = vpop.permute.xlu1 %3529 }
 0x175   : > { %v1946_v1 = vpack.c.bf16 %v1926_v11, %v1925_v4  ;;  %v3525_v32 = vpop.permute.xlu0 %3524  ;;  %v3532_v28 = vunpack.i.h.bf16 %v3530_v30  ;;  %v3531_v42 = vunpack.i.l.bf16 %v3530_v30 }
 0x176   : > { %v3527_v38 = vunpack.i.h.bf16 %v3525_v32  ;;  %v3526_v23 = vunpack.i.l.bf16 %v3525_v32 }
 0x177   : > { %2899 = vmatmul.mubr.msk.bf16.gmra.mrb[20].mxu0 %vm1978_vm12, %v1946_v1  ;;  %v1731_v47 = vsel %vm1704_vm5, %v1698_v52, %v3531_v42  ;;  %v1732_v59 = vsel %vm1704_vm5, %v1699_v16, %v3532_v28 }
 0x178   : > { %v3540_v33 = vpop.permute.xlu1 %3539  ;;  %v1730_v51 = vsel %vm1704_vm5, %v1697_v55, %v3527_v38  ;;  %v1729_v60 = vsel %vm1704_vm5, %v1696_v31, %v3526_v23 }
 0x179   : > { %v3535_v27 = vpop.permute.xlu0 %3534  ;;  %v3542_v10 = vunpack.i.h.bf16 %v3540_v33  ;;  %v3541_v48 = vunpack.i.l.bf16 %v3540_v33 }
 0x17a   : > { %v3537_v53 = vunpack.i.h.bf16 %v3535_v27  ;;  %v3536_v18 = vunpack.i.l.bf16 %v3535_v27 }
 0x17b   : > { %v1764_v63 = vsel %vm1737_vm6, %v1731_v47, %v3541_v48  ;;  %v1765_v0 = vsel %vm1737_vm6, %v1732_v59, %v3542_v10 }
 0x17c   : > { %v4638_v43 = vpop.permute.xlu1 %3549  ;;  %v1762_v44 = vsel %vm1737_vm6, %v1729_v60, %v3536_v18  ;;  %v1763_v3 = vsel %vm1737_vm6, %v1730_v51, %v3537_v53 }
 0x17d   : > { %v3545_v54 = vpop.permute.xlu0 %3544  ;;  %v3552_v7 = vunpack.i.h.bf16 %v4638_v43  ;;  %v3551_v8 = vunpack.i.l.bf16 %v4638_v43 }
 0x17e   : > { %v3547_v61 = vunpack.i.h.bf16 %v3545_v54  ;;  %v3546_v22 = vunpack.i.l.bf16 %v3545_v54 }
 0x17f   : > { %v1797_v40 = vsel %vm1770_vm7, %v1764_v63, %v3551_v8  ;;  %v1798_v56 = vsel %vm1770_vm7, %v1765_v0, %v3552_v7 }
 0x180   : > { %v4640_v39 = vpop.permute.xlu1 %3559  ;;  %v1795_v13 = vsel %vm1770_vm7, %v1762_v44, %v3546_v22  ;;  %v1796_v14 = vsel %vm1770_vm7, %v1763_v3, %v3547_v61 }
 0x181   : > { %v3555_v29 = vpop.permute.xlu0 %3554  ;;  %v3562_v15 = vunpack.i.h.bf16 %v4640_v39  ;;  %v3561_v25 = vunpack.i.l.bf16 %v4640_v39 }
 0x182   : > { %v3557_v2 = vunpack.i.h.bf16 %v3555_v29  ;;  %v3556_v36 = vunpack.i.l.bf16 %v3555_v29 }
 0x183   : > { %v1830_v42 = vsel %vm1803_vm8, %v1797_v40, %v3561_v25  ;;  %v1831_v45 = vsel %vm1803_vm8, %v1798_v56, %v3562_v15 }
 0x184   : > { %v3570_v24 = vpop.permute.xlu1 %3569  ;;  %v1828_v26 = vsel %vm1803_vm8, %v1795_v13, %v3556_v36  ;;  %v1829_v21 = vsel %vm1803_vm8, %v1796_v14, %v3557_v2 }
 0x185   : > { %v3565_v35 = vpop.permute.xlu0 %3564  ;;  %v3572_v11 = vunpack.i.h.bf16 %v3570_v24  ;;  %v3571_v4 = vunpack.i.l.bf16 %v3570_v24 }
 0x186   : > { %v3567_v46 = vunpack.i.h.bf16 %v3565_v35  ;;  %v3566_v37 = vunpack.i.l.bf16 %v3565_v35 }
 0x187   : > { %v1863_v23 = vsel %vm1836_vm9, %v1830_v42, %v3571_v4  ;;  %v1864_v24 = vsel %vm1836_vm9, %v1831_v45, %v3572_v11 }
 0x188   : > { %v3580_v58 = vpop.permute.xlu1 %3579  ;;  %v1861_v1 = vsel %vm1836_vm9, %v1828_v26, %v3566_v37  ;;  %v1862_v32 = vsel %vm1836_vm9, %v1829_v21, %v3567_v46 }
 0x189   : > { %v3575_v20 = vpop.permute.xlu0 %3574  ;;  %v3582_v43 = vunpack.i.h.bf16 %v3580_v58  ;;  %v3581_v54 = vunpack.i.l.bf16 %v3580_v58 }
 0x18a   : > { %v3577_v9 = vunpack.i.h.bf16 %v3575_v20  ;;  %v3576_v50 = vunpack.i.l.bf16 %v3575_v20 }
 0x18b   : > { %v1896_v35 = vsel %vm1869_vm10, %v1863_v23, %v3581_v54  ;;  %v1897_v49 = vsel %vm1869_vm10, %v1864_v24, %v3582_v43 }
 0x18c   : > { %v3590_v34 = vpop.permute.xlu1 %3589  ;;  %v1894_v29 = vsel %vm1869_vm10, %v1861_v1, %v3576_v50  ;;  %v1895_v39 = vsel %vm1869_vm10, %v1862_v32, %v3577_v9 }
 0x18d   : > { %v3585_v30 = vpop.permute.xlu0 %3584  ;;  %v3592_v47 = vunpack.i.h.bf16 %v3590_v34  ;;  %v3591_v59 = vunpack.i.l.bf16 %v3590_v34 }
 0x18e   : > { %v3587_v33 = vunpack.i.h.bf16 %v3585_v30  ;;  %v3586_v27 = vunpack.i.l.bf16 %v3585_v30 }
 0x18f   : > { %v1701_v36 = vsel %vm326_vm3, %v4326_v6, %v3592_v47  ;;  %v1700_v20 = vsel %vm326_vm3, %v4324_v5, %v3591_v59 }
 0x190   : > { %v1927_v62 = vsel %vm1902_vm11, %v1894_v29, %v3586_v27  ;;  %v1928_v57 = vsel %vm1902_vm11, %v1895_v39, %v3587_v33  ;;  %v3600_v28 = vpop.permute.xlu1 %3599 }
 0x191   : > { %v1947_v19 = vpack.c.bf16 %v1928_v57, %v1927_v62  ;;  %v3595_v38 = vpop.permute.xlu0 %3594  ;;  %v3602_v60 = vunpack.i.h.bf16 %v3600_v28  ;;  %v3601_v61 = vunpack.i.l.bf16 %v3600_v28 }
 0x192   : > { %v3597_v10 = vunpack.i.h.bf16 %v3595_v38  ;;  %v3596_v48 = vunpack.i.l.bf16 %v3595_v38 }
 0x193   : > { %2902 = vmatprep.mubr.msk.bf16.mxu0 %vm1978_vm12, %v1947_v19  ;;  %v1703_v3 = vsel %vm326_vm3, %v4342_v41, %v3602_v60  ;;  %v1702_v46 = vsel %vm326_vm3, %v4340_v17, %v3601_v61  ;;  %v4707_v19 = vld [vmem:[%s4852_s2] ss:$0 sm:$0xff] }
 0x194   : > { %v1930_v16 = vsel %vm1902_vm11, %v1897_v49, %v3597_v10  ;;  %v1929_v12 = vsel %vm1902_vm11, %v1896_v35, %v3596_v48  ;;  %v3610_v52 = vpop.permute.xlu1 %3609 }
 0x195   : > { %v1948_v53 = vpack.c.bf16 %v1930_v16, %v1929_v12  ;;  %v3605_v18 = vpop.permute.xlu0 %3604  ;;  %v3612_v58 = vunpack.i.h.bf16 %v3610_v52  ;;  %v3611_v63 = vunpack.i.l.bf16 %v3610_v52 }
 0x196   : > { %v3607_v0 = vunpack.i.h.bf16 %v3605_v18  ;;  %v3606_v2 = vunpack.i.l.bf16 %v3605_v18 }
 0x197   : > { %2903 = vmatmul.mubr.msk.bf16.gmra.mrb[24].mxu0 %vm1978_vm12, %v1948_v53  ;;  %v1735_v9 = vsel %vm1704_vm5, %v1702_v46, %v3611_v63  ;;  %v1736_v50 = vsel %vm1704_vm5, %v1703_v3, %v3612_v58 }
 0x198   : > { %v3620_v55 = vpop.permute.xlu1 %3619  ;;  %v1734_v6 = vsel %vm1704_vm5, %v1701_v36, %v3607_v0  ;;  %v1733_v5 = vsel %vm1704_vm5, %v1700_v20, %v3606_v2 }
 0x199   : > { %v3615_v31 = vpop.permute.xlu0 %3614  ;;  %v3622_v37 = vunpack.i.h.bf16 %v3620_v55  ;;  %v3621_v7 = vunpack.i.l.bf16 %v3620_v55 }
 0x19a   : > { %v3617_v13 = vunpack.i.h.bf16 %v3615_v31  ;;  %v3616_v14 = vunpack.i.l.bf16 %v3615_v31 }
 0x19b   : > { %v1768_v11 = vsel %vm1737_vm6, %v1735_v9, %v3621_v7  ;;  %v1769_v4 = vsel %vm1737_vm6, %v1736_v50, %v3622_v37 }
 0x19c   : > { %v3630_v51 = vpop.permute.xlu1 %3629  ;;  %v1766_v33 = vsel %vm1737_vm6, %v1733_v5, %v3616_v14  ;;  %v1767_v27 = vsel %vm1737_vm6, %v1734_v6, %v3617_v13 }
 0x19d   : > { %v3625_v22 = vpop.permute.xlu0 %3624  ;;  %v3632_v15 = vunpack.i.h.bf16 %v3630_v51  ;;  %v3631_v25 = vunpack.i.l.bf16 %v3630_v51 }
 0x19e   : > { %v3627_v34 = vunpack.i.h.bf16 %v3625_v22  ;;  %v3626_v41 = vunpack.i.l.bf16 %v3625_v22 }
 0x19f   : > { %v1801_v29 = vsel %vm1770_vm7, %v1768_v11, %v3631_v25  ;;  %v1802_v39 = vsel %vm1770_vm7, %v1769_v4, %v3632_v15 }
 0x1a0   : > { %v3640_v44 = vpop.permute.xlu1 %3639  ;;  %v1799_v62 = vsel %vm1770_vm7, %v1766_v33, %v3626_v41  ;;  %v1800_v57 = vsel %vm1770_vm7, %v1767_v27, %v3627_v34 }
 0x1a1   : > { %v3635_v8 = vpop.permute.xlu0 %3634  ;;  %v3642_v26 = vunpack.i.h.bf16 %v3640_v44  ;;  %v3641_v21 = vunpack.i.l.bf16 %v3640_v44 }
 0x1a2   : > { %v3637_v30 = vunpack.i.h.bf16 %v3635_v8  ;;  %v3636_v1 = vunpack.i.l.bf16 %v3635_v8 }
 0x1a3   : > { %v1834_v28 = vsel %vm1803_vm8, %v1801_v29, %v3641_v21  ;;  %v1835_v42 = vsel %vm1803_vm8, %v1802_v39, %v3642_v26 }
 0x1a4   : > { %v3650_v17 = vpop.permute.xlu1 %3649  ;;  %v1832_v38 = vsel %vm1803_vm8, %v1799_v62, %v3636_v1  ;;  %v1833_v23 = vsel %vm1803_vm8, %v1800_v57, %v3637_v30 }
 0x1a5   : > { %v3645_v32 = vpop.permute.xlu0 %3644  ;;  %v3652_v43 = vunpack.i.h.bf16 %v3650_v17  ;;  %v3651_v54 = vunpack.i.l.bf16 %v3650_v17 }
 0x1a6   : > { %v3647_v40 = vunpack.i.h.bf16 %v3645_v32  ;;  %v3646_v56 = vunpack.i.l.bf16 %v3645_v32 }
 0x1a7   : > { %v1867_v35 = vsel %vm1836_vm9, %v1834_v28, %v3651_v54  ;;  %v1868_v49 = vsel %vm1836_vm9, %v1835_v42, %v3652_v43 }
 0x1a8   : > { %v3660_v45 = vpop.permute.xlu1 %3659  ;;  %v1865_v53 = vsel %vm1836_vm9, %v1832_v38, %v3646_v56  ;;  %v1866_v18 = vsel %vm1836_vm9, %v1833_v23, %v3647_v40 }
 0x1a9   : > { %v3662_v24 = vunpack.i.h.bf16 %v3660_v45  ;;  %v3661_v10 = vunpack.i.l.bf16 %v3660_v45  ;;  %v3655_v48 = vpop.permute.xlu0 %3654 }
 0x1aa   : > { %v3657_v16 = vunpack.i.h.bf16 %v3655_v48  ;;  %v3656_v12 = vunpack.i.l.bf16 %v3655_v48  ;;  %v2880_v52 = vpop.f32.mrb[0].mxu0 }
 0x1ab   : > { %v1900_v55 = vsel %vm1869_vm10, %v1867_v35, %v3661_v10  ;;  %v2074_v31 = vadd.f32 %v2880_v52, %v4707_v19  ;;  %v2065_v47 = vpop.f32.mrb[1].mxu0  ;;  %v1901_v59 = vsel %vm1869_vm10, %v1868_v49, %v3662_v24 }
 0x1ac   : > { %v1898_v51 = vsel %vm1869_vm10, %v1865_v53, %v3656_v12  ;;  %v1899_v60 = vsel %vm1869_vm10, %v1866_v18, %v3657_v16  ;;  %v2066_v61 = vadd.f32 %v4707_v19, %v2065_v47  ;;  %v2881_v22 = vpop.f32.mrb[2].mxu0  ;;  %v3670_v58 = vpop.permute.xlu1 %3669 }
 0x1ad   : > { %v2354_v63 = vmul.f32 %v2074_v31, %v2074_v31  ;;  %v2077_v0 = vadd.f32 %v2881_v22, %v4707_v19  ;;  %v3672_v2 = vunpack.i.h.bf16 %v3670_v58  ;;  %v3671_v36 = vunpack.i.l.bf16 %v3670_v58  ;;  %v3665_v20 = vpop.permute.xlu0 %3664  ;;  %v2068_v44 = vpop.f32.mrb[3].mxu0 }
 0x1ae   : > { %v3667_v3 = vunpack.i.h.bf16 %v3665_v20  ;;  %v3666_v46 = vunpack.i.l.bf16 %v3665_v20  ;;  %v2069_v37 = vadd.f32 %v4707_v19, %v2068_v44  ;;  %v2352_v7 = vmul.f32 %v2066_v61, %v2066_v61 }
 0x1af   : > { %v2751_v8 = vpack.c.bf16 %v2077_v0, %v2074_v31  ;;  %v2355_v9 = vmul.f32 %v2077_v0, %v2077_v0  ;;  %v1933_v50 = vsel %vm1902_vm11, %v1900_v55, %v3671_v36  ;;  %v1934_v13 = vsel %vm1902_vm11, %v1901_v59, %v3672_v2 }
 0x1b0   : > { %v1950_v14 = vpack.c.bf16 %v1934_v13, %v1933_v50  ;;  %v1931_v6 = vsel %vm1902_vm11, %v1898_v51, %v3666_v46  ;;  %v1932_v5 = vsel %vm1902_vm11, %v1899_v60, %v3667_v3  ;;  %v2353_v15 = vmul.f32 %v2069_v37, %v2069_v37 }
 0x1b1   : > { %2838 = vst [vmem:[%s3871_s8 + $0x8] sm:$0xff] %v2751_v8   ;;  %v1949_v25 = vpack.c.bf16 %v1932_v5, %v1931_v6  ;;  %v2746_v34 = vpack.c.bf16 %v2069_v37, %v2066_v61  ;;  %v2914_v41 = vpack.c.bf16 %v2355_v9, %v2354_v63  ;;  %v3781_v46 = vmov 1.0  }
 0x1b2   : > { %v2910_v26 = vpack.c.bf16 %v2353_v15, %v2352_v7  ;;  %2448 = vmatprep.mubr.f32.mxu1 %v3781_v46 }
 0x1b3   : > { %2906 = vmatprep.mubr.msk.bf16.mxu0 %vm1978_vm12, %v1949_v25  ;;  %2747 = vst [vmem:[%s3871_s8] sm:$0xff] %v2746_v34  }
 0x1b4   : > { %2907 = vmatmul.mubr.msk.bf16.gmra.mrb[28].mxu0 %vm1978_vm12, %v1950_v14  ;;  %2911 = vmatprep.subr.bf16.mxu1 %v2910_v26 }
 0x1b5   : > { %2913 = vmatpush1.bf16.msra.mxu1 %v2746_v34 }
 0x1b6   : > { %2915 = vmatprep.subr.bf16.mxu1 %v2914_v41 }
 0x1b9   : > { %2917 = vmatpush1.bf16.msra.mxu1 %v2751_v8 }
 0x1ca   : > { %v2884_v21 = vpop.f32.mrb[4].mxu0 }
 0x1cb   : > { %v2090_v17 = vadd.f32 %v2884_v21, %v4707_v19  ;;  %v2081_v11 = vpop.f32.mrb[5].mxu0 }
 0x1cc   : > { %v2082_v4 = vadd.f32 %v4707_v19, %v2081_v11  ;;  %v2885_v30 = vpop.f32.mrb[6].mxu0 }
 0x1cd   : > { %v2093_v1 = vadd.f32 %v2885_v30, %v4707_v19  ;;  %v2084_v32 = vpop.f32.mrb[7].mxu0  ;;  %v2358_v27 = vmul.f32 %v2090_v17, %v2090_v17 }
 0x1ce   : > { %v2085_v33 = vadd.f32 %v4707_v19, %v2084_v32  ;;  %v2356_v29 = vmul.f32 %v2082_v4, %v2082_v4 }
 0x1cf   : > { %v2761_v43 = vpack.c.bf16 %v2093_v1, %v2090_v17  ;;  %v2359_v54 = vmul.f32 %v2093_v1, %v2093_v1 }
 0x1d0   : > { %v2756_v39 = vpack.c.bf16 %v2085_v33, %v2082_v4  ;;  %v2357_v40 = vmul.f32 %v2085_v33, %v2085_v33 }
 0x1d1   : > { %2840 = vst [vmem:[%s3871_s8 + $0x18] sm:$0xff] %v2761_v43   ;;  %v2922_v56 = vpack.c.bf16 %v2359_v54, %v2358_v27 }
 0x1d2   : > { %2839 = vst [vmem:[%s3871_s8 + $0x10] sm:$0xff] %v2756_v39   ;;  %v2918_v62 = vpack.c.bf16 %v2357_v40, %v2356_v29 }
 0x1d4   : > { %2919 = vmatprep.subr.bf16.mxu1 %v2918_v62 }
 0x1d5   : > { %2921 = vmatpush1.bf16.msra.mxu1 %v2756_v39 }
 0x1d6   : > { %2923 = vmatprep.subr.bf16.mxu1 %v2922_v56 }
 0x1d9   : > { %2925 = vmatpush1.bf16.msra.mxu1 %v2761_v43 }
 0x1ea   : > { %v2888_v57 = vpop.f32.mrb[8].mxu0 }
 0x1eb   : > { %v2106_v28 = vadd.f32 %v2888_v57, %v4707_v19  ;;  %v2097_v42 = vpop.f32.mrb[9].mxu0 }
 0x1ec   : > { %v2098_v45 = vadd.f32 %v4707_v19, %v2097_v42  ;;  %v2889_v38 = vpop.f32.mrb[10].mxu0 }
 0x1ed   : > { %v2109_v23 = vadd.f32 %v2889_v38, %v4707_v19  ;;  %v2100_v24 = vpop.f32.mrb[11].mxu0  ;;  %v2362_v48 = vmul.f32 %v2106_v28, %v2106_v28 }
 0x1ee   : > { %v2101_v10 = vadd.f32 %v4707_v19, %v2100_v24  ;;  %v2360_v16 = vmul.f32 %v2098_v45, %v2098_v45 }
 0x1ef   : > { %v2771_v35 = vpack.c.bf16 %v2109_v23, %v2106_v28  ;;  %v2363_v49 = vmul.f32 %v2109_v23, %v2109_v23 }
 0x1f0   : > { %v2766_v12 = vpack.c.bf16 %v2101_v10, %v2098_v45  ;;  %v2361_v52 = vmul.f32 %v2101_v10, %v2101_v10 }
 0x1f1   : > { %2842 = vst [vmem:[%s3871_s8 + $0x28] sm:$0xff] %v2771_v35   ;;  %v2930_v53 = vpack.c.bf16 %v2363_v49, %v2362_v48 }
 0x1f2   : > { %2841 = vst [vmem:[%s3871_s8 + $0x20] sm:$0xff] %v2766_v12   ;;  %v2926_v18 = vpack.c.bf16 %v2361_v52, %v2360_v16 }
 0x1f4   : > { %2927 = vmatprep.subr.bf16.mxu1 %v2926_v18 }
 0x1f5   : > { %2929 = vmatpush1.bf16.msra.mxu1 %v2766_v12 }
 0x1f6   : > { %2931 = vmatprep.subr.bf16.mxu1 %v2930_v53 }
 0x1f9   : > { %2933 = vmatpush1.bf16.msra.mxu1 %v2771_v35 }
 0x20a   : > { %v2892_v55 = vpop.f32.mrb[12].mxu0 }
 0x20b   : > { %v2122_v31 = vadd.f32 %v2892_v55, %v4707_v19  ;;  %v2113_v47 = vpop.f32.mrb[13].mxu0 }
 0x20c   : > { %v2114_v59 = vadd.f32 %v4707_v19, %v2113_v47  ;;  %v2893_v51 = vpop.f32.mrb[14].mxu0 }
 0x20d   : > { %v2125_v60 = vadd.f32 %v2893_v51, %v4707_v19  ;;  %v2116_v61 = vpop.f32.mrb[15].mxu0  ;;  %v2366_v58 = vmul.f32 %v2122_v31, %v2122_v31 }
 0x20e   : > { %v2117_v22 = vadd.f32 %v4707_v19, %v2116_v61  ;;  %v2364_v2 = vmul.f32 %v2114_v59, %v2114_v59 }
 0x20f   : > { %v2781_v63 = vpack.c.bf16 %v2125_v60, %v2122_v31  ;;  %v2367_v0 = vmul.f32 %v2125_v60, %v2125_v60 }
 0x210   : > { %v2776_v36 = vpack.c.bf16 %v2117_v22, %v2114_v59  ;;  %v2365_v20 = vmul.f32 %v2117_v22, %v2117_v22 }
 0x211   : > { %2844 = vst [vmem:[%s3871_s8 + $0x38] sm:$0xff] %v2781_v63   ;;  %v2938_v44 = vpack.c.bf16 %v2367_v0, %v2366_v58 }
 0x212   : > { %2843 = vst [vmem:[%s3871_s8 + $0x30] sm:$0xff] %v2776_v36   ;;  %v2934_v3 = vpack.c.bf16 %v2365_v20, %v2364_v2 }
 0x214   : > { %2935 = vmatprep.subr.bf16.mxu1 %v2934_v3 }
 0x215   : > { %2937 = vmatpush1.bf16.msra.mxu1 %v2776_v36 }
 0x216   : > { %2939 = vmatprep.subr.bf16.mxu1 %v2938_v44 }
 0x219   : > { %2941 = vmatpush1.bf16.msra.mxu1 %v2781_v63 }
 0x22a   : > { %v2896_v37 = vpop.f32.mrb[16].mxu0 }
 0x22b   : > { %v2138_v7 = vadd.f32 %v2896_v37, %v4707_v19  ;;  %v2129_v8 = vpop.f32.mrb[17].mxu0 }
 0x22c   : > { %v2130_v9 = vadd.f32 %v4707_v19, %v2129_v8  ;;  %v2897_v50 = vpop.f32.mrb[18].mxu0 }
 0x22d   : > { %v2141_v13 = vadd.f32 %v2897_v50, %v4707_v19  ;;  %v2132_v14 = vpop.f32.mrb[19].mxu0  ;;  %v2370_v5 = vmul.f32 %v2138_v7, %v2138_v7 }
 0x22e   : > { %v2133_v6 = vadd.f32 %v4707_v19, %v2132_v14  ;;  %v2368_v34 = vmul.f32 %v2130_v9, %v2130_v9 }
 0x22f   : > { %v2791_v15 = vpack.c.bf16 %v2141_v13, %v2138_v7  ;;  %v2371_v25 = vmul.f32 %v2141_v13, %v2141_v13 }
 0x230   : > { %v2786_v41 = vpack.c.bf16 %v2133_v6, %v2130_v9  ;;  %v2369_v26 = vmul.f32 %v2133_v6, %v2133_v6 }
 0x231   : > { %2846 = vst [vmem:[%s3871_s8 + $0x48] sm:$0xff] %v2791_v15   ;;  %v2946_v21 = vpack.c.bf16 %v2371_v25, %v2370_v5 }
 0x232   : > { %2845 = vst [vmem:[%s3871_s8 + $0x40] sm:$0xff] %v2786_v41   ;;  %v2942_v17 = vpack.c.bf16 %v2369_v26, %v2368_v34 }
 0x234   : > { %2943 = vmatprep.subr.bf16.mxu1 %v2942_v17 }
 0x235   : > { %2945 = vmatpush1.bf16.msra.mxu1 %v2786_v41 }
 0x236   : > { %2947 = vmatprep.subr.bf16.mxu1 %v2946_v21 }
 0x239   : > { %2949 = vmatpush1.bf16.msra.mxu1 %v2791_v15 }
 0x24a   : > { %v2900_v11 = vpop.f32.mrb[20].mxu0 }
 0x24b   : > { %v2154_v4 = vadd.f32 %v2900_v11, %v4707_v19  ;;  %v2145_v30 = vpop.f32.mrb[21].mxu0 }
 0x24c   : > { %v2146_v1 = vadd.f32 %v4707_v19, %v2145_v30  ;;  %v2901_v32 = vpop.f32.mrb[22].mxu0 }
 0x24d   : > { %v2157_v33 = vadd.f32 %v2901_v32, %v4707_v19  ;;  %v2148_v27 = vpop.f32.mrb[23].mxu0  ;;  %v2374_v54 = vmul.f32 %v2154_v4, %v2154_v4 }
 0x24e   : > { %v2149_v43 = vadd.f32 %v4707_v19, %v2148_v27  ;;  %v2372_v40 = vmul.f32 %v2146_v1, %v2146_v1 }
 0x24f   : > { %v2801_v29 = vpack.c.bf16 %v2157_v33, %v2154_v4  ;;  %v2375_v39 = vmul.f32 %v2157_v33, %v2157_v33 }
 0x250   : > { %v2796_v56 = vpack.c.bf16 %v2149_v43, %v2146_v1  ;;  %v2373_v62 = vmul.f32 %v2149_v43, %v2149_v43 }
 0x251   : > { %2848 = vst [vmem:[%s3871_s8 + $0x58] sm:$0xff] %v2801_v29   ;;  %v2954_v57 = vpack.c.bf16 %v2375_v39, %v2374_v54 }
 0x252   : > { %2847 = vst [vmem:[%s3871_s8 + $0x50] sm:$0xff] %v2796_v56   ;;  %v2950_v28 = vpack.c.bf16 %v2373_v62, %v2372_v40 }
 0x254   : > { %2951 = vmatprep.subr.bf16.mxu1 %v2950_v28 }
 0x255   : > { %2953 = vmatpush1.bf16.msra.mxu1 %v2796_v56 }
 0x256   : > { %2955 = vmatprep.subr.bf16.mxu1 %v2954_v57 }
 0x259   : > { %2957 = vmatpush1.bf16.msra.mxu1 %v2801_v29 }
 0x26a   : > { %v2904_v42 = vpop.f32.mrb[24].mxu0 }
 0x26b   : > { %v2170_v45 = vadd.f32 %v2904_v42, %v4707_v19  ;;  %v2161_v38 = vpop.f32.mrb[25].mxu0 }
 0x26c   : > { %v2162_v23 = vadd.f32 %v4707_v19, %v2161_v38  ;;  %v2905_v24 = vpop.f32.mrb[26].mxu0 }
 0x26d   : > { %v2173_v10 = vadd.f32 %v2905_v24, %v4707_v19  ;;  %v2164_v48 = vpop.f32.mrb[27].mxu0  ;;  %v2378_v49 = vmul.f32 %v2170_v45, %v2170_v45 }
 0x26e   : > { %v2165_v35 = vadd.f32 %v4707_v19, %v2164_v48  ;;  %v2376_v52 = vmul.f32 %v2162_v23, %v2162_v23 }
 0x26f   : > { %v2811_v16 = vpack.c.bf16 %v2173_v10, %v2170_v45  ;;  %v2379_v12 = vmul.f32 %v2173_v10, %v2173_v10 }
 0x270   : > { %v2806_v53 = vpack.c.bf16 %v2165_v35, %v2162_v23  ;;  %v2377_v18 = vmul.f32 %v2165_v35, %v2165_v35 }
 0x271   : > { %2850 = vst [vmem:[%s3871_s8 + $0x68] sm:$0xff] %v2811_v16   ;;  %v2962_v55 = vpack.c.bf16 %v2379_v12, %v2378_v49 }
 0x272   : > { %2849 = vst [vmem:[%s3871_s8 + $0x60] sm:$0xff] %v2806_v53   ;;  %v2958_v31 = vpack.c.bf16 %v2377_v18, %v2376_v52 }
 0x274   : > { %2959 = vmatprep.subr.bf16.mxu1 %v2958_v31 }
 0x275   : > { %2961 = vmatpush1.bf16.msra.mxu1 %v2806_v53 }
 0x276   : > { %2963 = vmatprep.subr.bf16.mxu1 %v2962_v55 }
 0x279   : > { %2965 = vmatpush1.bf16.msra.mxu1 %v2811_v16 }
 0x287   : > { %v2908_v47 = vpop.f32.mrb[28].mxu0 }
 0x288   : > { %v2186_v59 = vadd.f32 %v2908_v47, %v4707_v19  ;;  %v2177_v51 = vpop.f32.mrb[29].mxu0 }
 0x289   : > { %v2178_v60 = vadd.f32 %v4707_v19, %v2177_v51  ;;  %v2909_v61 = vpop.f32.mrb[30].mxu0 }
 0x28a   : > { %v2189_v22 = vadd.f32 %v2909_v61, %v4707_v19  ;;  %v2180_v58 = vpop.f32.mrb[31].mxu0  ;;  %v2382_v0 = vmul.f32 %v2186_v59, %v2186_v59 }
 0x28b   : > { %v2181_v63 = vadd.f32 %v4707_v19, %v2180_v58  ;;  %v2380_v20 = vmul.f32 %v2178_v60, %v2178_v60 }
 0x28c   : > { %v2821_v2 = vpack.c.bf16 %v2189_v22, %v2186_v59  ;;  %v2383_v36 = vmul.f32 %v2189_v22, %v2189_v22 }
 0x28d   : > { %v2816_v44 = vpack.c.bf16 %v2181_v63, %v2178_v60  ;;  %v2381_v3 = vmul.f32 %v2181_v63, %v2181_v63 }
 0x28e   : > { %2852 = vst [vmem:[%s3871_s8 + $0x78] sm:$0xff] %v2821_v2   ;;  %v2970_v37 = vpack.c.bf16 %v2383_v36, %v2382_v0 }
 0x28f   : > { %2851 = vst [vmem:[%s3871_s8 + $0x70] sm:$0xff] %v2816_v44   ;;  %v2966_v7 = vpack.c.bf16 %v2381_v3, %v2380_v20 }
 0x291   : > { %2967 = vmatprep.subr.bf16.mxu1 %v2966_v7 }
 0x292   : > { %2969 = vmatpush1.bf16.msra.mxu1 %v2816_v44 }
 0x293   : > { %2971 = vmatprep.subr.bf16.mxu1 %v2970_v37 }
 0x296   : > { %2973 = vmatpush1.bf16.msra.mxu1 %v2821_v2 }
 0x299   : > { %2449 = vmatmul.mubr.f32.vlgmr.msra.gmra.mrb[0].mxu1 %v3781_v46 }
 0x29a   : > { %3691 = shalt.err (!%p3688_p7)
}
 0x29b   : > { %s3692_s27 = scalar_lea.hbm %s4779_s14, 2048  ;;  %s3696_s6 = scalar_lea.hbm %s4853_s3, 4096 }
 0x29c   : > { %p3693_p8 = scmp.ne.s32.totalorder %s4779_s14, %s3692_s27  ;;  %p3697_p11 = scmp.lt.u32.totalorder %s4779_s14, %s4853_s3 }
 0x29d   : > { %p3698_p12 = scmp.lt.u32.totalorder %s3696_s6, %s3692_s27  ;;  %p3700_p0 = scmp.lt.u32.totalorder %s3692_s27, %s4779_s14 }
 0x29e   : > { %p3694_p9 = pnand %p3693_p8, %p3851_p5 }
 0x29f   : > { %p3699_p13 = por %p3698_p12, %p3697_p11 }
 0x2a0   : > { %p3695_p10 = pneg %p3694_p9 }
 0x2a1   : > { %p3701_p1 = por %p3700_p0, %p3699_p13 }
 0x2a3   : > { %p3702_p3 = pnand %p3701_p1, %p3695_p10 }
 0x2a5   : > { %3705 = shalt.err (!%p3702_p3)
}
 0x2a6   : > { %s3783_s11 = smov 64   ;;  %v3784_v19 = vmov 1966171168   ;;  %v2462_v8 = vlaneseq  ;;  %v2455_v25 = vld [vmem:[#allocation5] sm:$0x3]  ;;  %s3785_s12 = smov [#allocation5]  }
 0x2a7   : > { %2975 = dma.vmem_to_hbm [thread:$0]  (%p3851_p5), %s4782_s20, 2048, %s4779_s14, %s4786_s22, %s3783_s11, %s3783_s11, %s3774_s10   ;;  %v2460_v46 = vunpack.c.l.s4 %v3784_v19 }
 0x2a8   : > { %v2463_v50 = vshrl.u32 %v2462_v8, 7  ;;  %s2508_s13 = sshll.u32 %s3785_s12, 4  ;;  %vm2477_vm13 = vcmp.lt.s32.totalorder %v2462_v8, 256  ;;  %s2509_s13 = int_to_ptr.vmem [resolvable:$true] %s2508_s13 }
 0x2a9   : > { %v2461_v9 = vunpack.c.0.s8 %v2460_v46  ;;  %s3706_s25 = scalar_lea.vmem %s2509_s13, 32  ;;  %p3713_p8 = scmp.lt.s32.totalorder %s2509_s13, %s2509_s13 }
 0x2aa   : > { %p3707_p5 = scmp.ne.s32.totalorder %s2509_s13, %s3706_s25  ;;  %p3714_p9 = scmp.lt.s32.totalorder %s3706_s25, %s3706_s25 }
 0x2ab   : > { %v2464_v14 = vsub.s32 %v2461_v9, %v2463_v50 }
 0x2ac   : > { %p3708_p4 = pnand %p3707_p5, %p105_p2  ;;  %p3715_p10 = por %p3714_p9, %p3713_p8 }
 0x2ae   : > { %p3709_p7 = pneg %p3708_p4 }
 0x2b0   : > { %p3716_p11 = pnand %p3715_p10, %p3709_p7 }
 0x36c   : > { %v2450_v13 = vpop.f32.mrb[0].mxu1 }
 0x36d   : > { %v2452_v6 = vpop.f32.mrb[1].mxu1 }
 0x36e   : > { %v2458_v5 = vcombine.low %v2450_v13, %v2452_v6 }
 0x370   : > { %v2465_v15 = vrot.slane %v2458_v5, %v2464_v14 }
 0x372   : > { %v2472_v34 = vrot.slane %v2465_v15, %v2464_v14 }
 0x374   : > { %v2474_v41 = vadd.f32 %v2472_v34, %v2455_v25 }
 0x376   : > { %2479 = vst.msk [vmem:[#allocation5] sm:$0x3] %vm2477_vm13, %v2474_v41 }
 0x377   : > { %3719 = shalt.err (!%p3716_p11)
}
 0x378   : > { %s3720_s20 = scalar_lea.hbm %s4854_s4, 32 }
 0x379   : > { %p3721_p12 = scmp.ne.s32.totalorder %s4854_s4, %s3720_s20  ;;  %p3726_p1 = scmp.lt.u32.totalorder %s3720_s20, %s4854_s4 }
 0x37b   : > { %p3722_p13 = pnand %p3721_p12, %p105_p2 }
 0x37d   : > { %p3723_p0 = pneg %p3722_p13 }
 0x37f   : > { %p3728_p3 = pnand %p3726_p1, %p3723_p0 }
 0x381   : > { %3731 = shalt.err (!%p3728_p3)
}
 0x382   : > { %2977 = dma.vmem_to_hbm [thread:$0]  (%p105_p2), %s2509_s13, 32, %s4854_s4, [#allocation6]  }
 0x383   : > { %3749 = dma.done.wait (%p105_p2), [#allocation6], 32  }
 0x384   : > { %3751 = vsyncadd (%p105_p2), [#allocation6], 4294967264 }
 0x385 PF: > { %p2987_p5 = scmp.ge.s32.totalorder %s3770_s18, 2  ;;  %s2524_s8 = sand.u32 1, %s3758_s15  }
 0x386   : > { %s2525_s5 = scalar_lea.sflag [#allocation4], %s2524_s8 }
 0x387   : > { %p2982_p4 = pnand %p2987_p5, %p3855_p6 }
 0x389   : > { %3753 = dma.done.wait (!%p2982_p4), %s2525_s5, 2048  }
 0x38a   : > { %3755 = vsyncadd (!%p2982_p4), %s2525_s5, 4294965248  ;;  %p16_p7 = scmp.ge.s32.totalorder %s3836_s21, 4   ;;  %s4857_s15 = smov %s3762_s16 }
 0x38b   : > { %s4858_s16 = smov %s3766_s17  ;;  %s4859_s17 = smov %s3847_s24 }
 0x38c   : > { %s4860_s18 = smov %s3836_s21  ;;  %18 = sbr.rel (!%p16_p7) target bundleno = 4 (0x4), region = 81 }
 0x393   :  { %2530 = vsyncpa [#allocation4], 1 }
 0x394   :  { %2532 = vsyncpa [#allocation4 + $0x1], 1 }
 0x395   :  { %2533 = vsyncpa [#allocation6], 1 }

</bundles_post_ra>
